<compile_context>
chip_gen: v6e
topology: v6e:2x2x1
jax: 0.10.0
libtpu: 0.0.40
codegen_flags: <defaults>
</compile_context>

<pallas_src>
import functools

import numpy as np
import jax
import jax.numpy as jnp
from jax import lax
from jax.experimental import pallas as pl
from jax.experimental.pallas import tpu as pltpu


def pa_block_kernel(x_ref, pool_ref, w1bd_ref, whbd_ref, wwbd_ref,
                    eh_ref, ew_ref, wtap_ref, o_ref, *, bb, C, H, W):
    HW = H * W
    f32 = jnp.float32

    # ---- (1) H/W mean descriptors for all bb images in ONE bf16 MXU matmul.
    desc = jnp.dot(x_ref[...].astype(jnp.bfloat16), pool_ref[...],
                   preferred_element_type=f32)                      # (bb*C, H+W)

    # ---- (2) conv_1x1 (block-diagonal over bb images) + InstanceNorm + ReLU.
    #      Tiny f32 matmul; kept f32 because rsqrt(var) amplifies rounding and
    #      these dots are MXU-latency bound anyway (lever is bb, not dtype).
    y = jnp.dot(w1bd_ref[...], desc, preferred_element_type=f32)    # (bb*mid, H+W)
    mu = jnp.mean(y, axis=1, keepdims=True)
    yc = y - mu
    var = jnp.mean(yc * yc, axis=1, keepdims=True)
    r = jnp.maximum(yc * lax.rsqrt(var + 1e-5), 0.0)

    # ---- (3) F_h / F_w 1x1 convs + sigmoid on the small (bb*C, H|W) tensors.
    sig_h = jax.nn.sigmoid(jnp.dot(whbd_ref[...], r[:, :H],
                                   preferred_element_type=f32))     # (bb*C, H)
    sig_w = jax.nn.sigmoid(jnp.dot(wwbd_ref[...], r[:, H:],
                                   preferred_element_type=f32))     # (bb*C, W)

    # ---- (4) Batched channel mean/max planes for ALL bb images (no per-image
    #      loop): planes[:, :HW] = mean over C, planes[:, HW:] = max over C.
    x3 = x_ref[...].reshape(bb, C, HW).astype(f32)                  # (bb, C, HW)
    planes = jnp.concatenate(
        [jnp.mean(x3, axis=1), jnp.max(x3, axis=1)], axis=1)        # (bb, 2*HW)

    # ---- (5) 3x3 conv (2 -> 1 ch, pad 1, no bias) directly on the planes:
    #      9 lane rolls (XLU, which has slack) with per-tap zero-padding masks
    #      and conv weights folded into wtap rows (VPU mul-adds).  This replaces
    #      the old dense (2*HW, HW) operator matmul.
    wtap = wtap_ref[...]                                            # (9, 2*HW) f32
    acc = jnp.zeros((bb, 2 * HW), f32)
    for t in range(9):
        oi, oj = t // 3 - 1, t % 3 - 1
        shift = (-(oi * W + oj)) % (2 * HW)
        rolled = planes if shift == 0 else pltpu.roll(planes, shift, 1)
        acc = acc + rolled * wtap[t:t + 1, :]
    g = jax.nn.sigmoid(acc[:, :HW] + acc[:, HW:])                   # (bb, HW)

    # ---- (6) Expand the h/w gates to the lane-dense layout on the MXU (bf16
    #      operands, f32 accumulate), apply all three gates, ONE full store.
    gate = (jnp.dot(sig_h.astype(jnp.bfloat16), eh_ref[...],
                    preferred_element_type=f32)
            * jnp.dot(sig_w.astype(jnp.bfloat16), ew_ref[...],
                      preferred_element_type=f32))                  # (bb*C, HW)
    out3 = x3 * gate.reshape(bb, C, HW) * g[:, None, :]
    o_ref[...] = out3.reshape(bb * C, HW).astype(o_ref.dtype)


def _tensorcores_per_chip():
    try:
        kind = jax.devices()[0].device_kind.lower()
    except Exception:
        return 1
    # v4 / v5p (megacore) and v7x expose 2 TensorCores behind one device.
    return 2 if ("v5p" in kind or "v4" in kind or "7" in kind) else 1


def _vmem_budget_bytes():
    try:
        kind = jax.devices()[0].device_kind.lower()
    except Exception:
        return 40 << 20
    # v7x has 64 MiB physical VMEM per TensorCore; v5e/v6e have 128 MiB.
    return (40 << 20) if "7" in kind else (96 << 20)


def _pick_block_n(n, c, hw, itemsize, *, target_rows=256, max_block=64,
                  vmem_budget_bytes=None):
    """Images per grid step: a divisor of n that keeps the (bb*C, HW) block
    8-row aligned, fits double-buffered in+out blocks in the per-generation
    VMEM budget, and reaches ~target_rows of MXU M.  An even grid length is
    only preferred on megacore parts (v4/v5p/v7x) where
    dimension_semantics=('parallel',) splits the grid across TensorCores."""
    if vmem_budget_bytes is None:
        vmem_budget_bytes = _vmem_budget_bytes()

    def fits(bb):
        # 2 double-buffered (input + output) x-blocks + ~2 MiB of operators.
        return 4 * bb * c * hw * itemsize + (2 << 20) <= vmem_budget_bytes

    cands = [bb for bb in range(1, min(max_block, n) + 1)
             if n % bb == 0 and (bb * c) % 8 == 0 and fits(bb)]
    if not cands:
        return 1

    def choose(pool):
        reach = [bb for bb in pool if bb * c >= target_rows]
        return min(reach) if reach else max(pool)

    pick = choose(cands)
    if _tensorcores_per_chip() > 1:
        even = [bb for bb in cands if (n // bb) % 2 == 0]
        if even:
            pick = choose(even)
    return pick


def pa_block_forward(x, w1, wh, ww, wc, *, block_n=None):
    """x: (N, C, H, W); w1: (mid, C); wh/ww: (C, mid); wc: (1, 2, 3, 3)."""
    N, C, H, W = x.shape
    mid = w1.shape[0]
    HW = H * W
    f32, bf16 = jnp.float32, jnp.bfloat16
    itemsize = jnp.dtype(x.dtype).itemsize

    bb = _pick_block_n(N, C, HW, itemsize) if block_n is None else block_n
    assert N % bb == 0
    # (8, 128) alignment of the (bb*C, HW) block and the in-kernel (bb,C,HW) view.
    assert C % 8 == 0 and HW % 128 == 0, "need C % 8 == 0 and H*W % 128 == 0"
    steps = N // bb

    x2 = x.reshape(N * C, HW)                    # free view -> lane-dense layout

    # ---- static spatial helpers (flattened p = h*W + w), built once in numpy.
    p_idx = np.arange(HW)
    ph, pw = p_idx // W, p_idx % W

    # Pooling operator (exact in bf16 for power-of-two H/W):
    # x2 @ pool -> [mean over W | mean over H] per channel row.
    pool_np = np.zeros((HW, H + W), np.float32)
    pool_np[p_idx, ph] = 1.0 / W
    pool_np[p_idx, H + pw] = 1.0 / H
    pool = jnp.asarray(pool_np, dtype=bf16)

    # Gate-expansion operators (0/1 -> exact in bf16).
    eh = jnp.asarray((np.arange(H)[:, None] == ph[None, :]).astype(np.float32),
                     dtype=bf16)                                   # (H, HW)
    ew = jnp.asarray((np.arange(W)[:, None] == pw[None, :]).astype(np.float32),
                     dtype=bf16)                                   # (W, HW)

    # 3x3-conv taps: per-tap zero-padding masks (vectorized numpy) folded with
    # the conv1 weights into rows [mean-plane | max-plane] of length 2*HW,
    # consumed by the roll-based conv inside the kernel.
    oi = (np.arange(9) // 3 - 1)[:, None]
    oj = (np.arange(9) % 3 - 1)[:, None]
    masks_np = (((ph[None, :] + oi >= 0) & (ph[None, :] + oi < H)
                 & (pw[None, :] + oj >= 0) & (pw[None, :] + oj < W))
                .astype(np.float32))                               # (9, HW)
    masks = jnp.asarray(masks_np)
    wc2 = wc.astype(f32).reshape(2, 9)                             # [k, di*3+dj]
    wtap = jnp.concatenate([wc2[0][:, None] * masks,
                            wc2[1][:, None] * masks], axis=1)      # (9, 2*HW)

    # Block-diagonal weights: bb per-image 1x1 convs -> one matmul each.
    eye_bb = jnp.eye(bb, dtype=f32)
    w1bd = jnp.kron(eye_bb, w1.astype(f32))                        # (bb*mid, bb*C)
    whbd = jnp.kron(eye_bb, wh.astype(f32))                        # (bb*C, bb*mid)
    wwbd = jnp.kron(eye_bb, ww.astype(f32))                        # (bb*C, bb*mid)

    def _nbytes(a):
        return int(a.size) * jnp.dtype(a.dtype).itemsize

    op_bytes = sum(_nbytes(a) for a in (pool, eh, ew, wtap, w1bd, whbd, wwbd))
    needed = 4 * bb * C * HW * itemsize + 2 * op_bytes + (4 << 20)
    vmem_limit = int(max(32 << 20, min(needed, _vmem_budget_bytes())))

    # Advisory cost estimate for the XLA scheduler.
    mm_macs = ((bb * C) * HW * (H + W)                 # pooling descriptors
               + (bb * mid) * (bb * C) * (H + W)       # conv_1x1
               + (bb * C) * (bb * mid) * (H + W)       # F_h + F_w
               + (bb * C) * (H + W) * HW)              # gate expansion
    roll_flops = 9 * 2 * bb * 2 * HW                   # masked-tap mul-adds
    cost = pl.CostEstimate(
        flops=int(steps * (2 * mm_macs + roll_flops + 8 * bb * C * HW)),
        transcendentals=int(steps * (bb * C * (H + W) + bb * HW)),
        bytes_accessed=int(2 * N * C * HW * itemsize + op_bytes))

    kernel = functools.partial(pa_block_kernel, bb=bb, C=C, H=H, W=W)
    out2 = pl.pallas_call(
        kernel,
        out_shape=jax.ShapeDtypeStruct((N * C, HW), x.dtype),
        grid_spec=pltpu.PrefetchScalarGridSpec(
            num_scalar_prefetch=0,
            grid=(steps,),
            in_specs=[
                pl.BlockSpec((bb * C, HW), lambda b: (b, 0)),        # x (lane-dense)
                pl.BlockSpec((HW, H + W), lambda b: (0, 0)),         # pooling op (bf16)
                pl.BlockSpec((bb * mid, bb * C), lambda b: (0, 0)),  # conv_1x1 (blkdiag)
                pl.BlockSpec((bb * C, bb * mid), lambda b: (0, 0)),  # F_h (blkdiag)
                pl.BlockSpec((bb * C, bb * mid), lambda b: (0, 0)),  # F_w (blkdiag)
                pl.BlockSpec((H, HW), lambda b: (0, 0)),             # H-gate expander
                pl.BlockSpec((W, HW), lambda b: (0, 0)),             # W-gate expander
                pl.BlockSpec((9, 2 * HW), lambda b: (0, 0)),         # 3x3 tap weights
            ],
            out_specs=pl.BlockSpec((bb * C, HW), lambda b: (b, 0)),
        ),
        compiler_params=pltpu.CompilerParams(
            dimension_semantics=("parallel",),
            vmem_limit_bytes=vmem_limit),
        cost_estimate=cost,
    )(x2, pool, w1bd, whbd, wwbd, eh, ew, wtap)
    return out2.reshape(N, C, H, W)


def pa_block_ref(x, w1, wh, ww, wc):
    """Pure-JAX reference mirroring the PyTorch PA_Block forward (validation)."""
    N, C, H, W = x.shape
    x_h = jnp.mean(x, axis=3)                                 # (N, C, H)
    x_w = jnp.mean(x, axis=2)                                 # (N, C, W)
    xc = jnp.stack([jnp.mean(x, axis=1), jnp.max(x, axis=1)], axis=1)  # (N,2,H,W)
    xc_conv = lax.conv_general_dilated(
        xc, wc, window_strides=(1, 1), padding=((1, 1), (1, 1)),
        dimension_numbers=("NCHW", "OIHW", "NCHW"),
        precision=lax.Precision.HIGHEST)                      # (N, 1, H, W)
    y = jnp.concatenate([x_h, x_w], axis=2)                   # (N, C, H+W)
    y = jnp.einsum("mc,ncl->nml", w1, y, precision=lax.Precision.HIGHEST)
    mean = jnp.mean(y, axis=2, keepdims=True)
    var = jnp.mean(y * y, axis=2, keepdims=True) - mean * mean
    y = jnp.maximum((y - mean) * lax.rsqrt(var + 1e-5), 0.0)
    yh, yw = y[:, :, :H], y[:, :, H:]
    s_h = jax.nn.sigmoid(jnp.einsum("cm,nmh->nch", wh, yh,
                                    precision=lax.Precision.HIGHEST))
    s_w = jax.nn.sigmoid(jnp.einsum("cm,nmw->ncw", ww, yw,
                                    precision=lax.Precision.HIGHEST))
    return x * s_h[:, :, :, None] * s_w[:, :, None, :] * jax.nn.sigmoid(xc_conv)


if __name__ == "__main__":
    N, C, H, W = 4, 32, 16, 16
    reduction = 16
    mid = C // reduction

    key = jax.random.PRNGKey(0)
    kx, k1, k2, k3, k4 = jax.random.split(key, 5)
    x = jax.random.normal(kx, (N, C, H, W), jnp.float32)
    w1 = 0.1 * jax.random.normal(k1, (mid, C), jnp.float32)      # conv_1x1 weight
    wh = 0.1 * jax.random.normal(k2, (C, mid), jnp.float32)      # F_h weight
    ww = 0.1 * jax.random.normal(k3, (C, mid), jnp.float32)      # F_w weight
    wc = 0.1 * jax.random.normal(k4, (1, 2, 3, 3), jnp.float32)  # conv1 weight

    out = jax.block_until_ready(pa_block_forward(x, w1, wh, ww, wc))
    ref = jax.block_until_ready(pa_block_ref(x, w1, wh, ww, wc))
    max_err = float(jnp.max(jnp.abs(out - ref)))
    assert out.shape == (N, C, H, W)
    # bf16 MXU operands on the pooling / gate-expansion matmuls keep the error
    # well inside this bound (estimated ~5e-3 worst case at these shapes).
    assert max_err < 2e-2, f"mismatch vs reference: {max_err}"
    print("KERNEL_OK")
</pallas_src>

<mosaic_0001>
module attributes {stable_mosaic.version = 11 : i64} {
  func.func @pa_block_kernel(%arg0: i32, %arg1: memref<128x256xf32, #tpu.memory_space<vmem>>, %arg2: memref<256x32xbf16, #tpu.memory_space<vmem>>, %arg3: memref<8x128xf32, #tpu.memory_space<vmem>>, %arg4: memref<128x8xf32, #tpu.memory_space<vmem>>, %arg5: memref<128x8xf32, #tpu.memory_space<vmem>>, %arg6: memref<16x256xbf16, #tpu.memory_space<vmem>>, %arg7: memref<16x256xbf16, #tpu.memory_space<vmem>>, %arg8: memref<9x512xf32, #tpu.memory_space<vmem>>, %arg9: memref<128x256xf32, #tpu.memory_space<vmem>>) attributes {dimension_semantics = [#tpu.dimension_semantics<parallel>], iteration_bounds = array<i64: 1>, scalar_prefetch = 0 : i64, scratch_operands = 0 : i64, tpu.core_type = #tpu.core_type<tc>, window_params = [{transform_indices = @transform_0, window_bounds = array<i64: 128, 256>}, {pipeline_mode = #tpu.pipeline_mode<synchronous>, transform_indices = @transform_1, window_bounds = array<i64: 256, 32>}, {pipeline_mode = #tpu.pipeline_mode<synchronous>, transform_indices = @transform_2, window_bounds = array<i64: 8, 128>}, {pipeline_mode = #tpu.pipeline_mode<synchronous>, transform_indices = @transform_3, window_bounds = array<i64: 128, 8>}, {pipeline_mode = #tpu.pipeline_mode<synchronous>, transform_indices = @transform_4, window_bounds = array<i64: 128, 8>}, {pipeline_mode = #tpu.pipeline_mode<synchronous>, transform_indices = @transform_5, window_bounds = array<i64: 16, 256>}, {pipeline_mode = #tpu.pipeline_mode<synchronous>, transform_indices = @transform_6, window_bounds = array<i64: 16, 256>}, {pipeline_mode = #tpu.pipeline_mode<synchronous>, transform_indices = @transform_7, window_bounds = array<i64: 9, 512>}, {transform_indices = @transform_8, window_bounds = array<i64: 128, 256>}]} {
    %c0 = arith.constant 0 : index
    %c0_0 = arith.constant 0 : index
    %0 = vector.load %arg1[%c0, %c0_0] : memref<128x256xf32, #tpu.memory_space<vmem>>, vector<128x256xf32>
    %1 = arith.truncf %0 : vector<128x256xf32> to vector<128x256xbf16>
    %c0_1 = arith.constant 0 : index
    %c0_2 = arith.constant 0 : index
    %2 = vector.load %arg2[%c0_1, %c0_2] : memref<256x32xbf16, #tpu.memory_space<vmem>>, vector<256x32xbf16>
    %cst = arith.constant dense<0.000000e+00> : vector<128x32xf32>
    %3 = tpu.matmul %1, %2, %cst {dimension_numbers = #tpu.dot_dimension_numbers<[1], [0], [0], [1], [0, 0, 1, 1], [], []>} : vector<128x256xbf16>, vector<256x32xbf16>, vector<128x32xf32> -> vector<128x32xf32>
    %c0_3 = arith.constant 0 : index
    %c0_4 = arith.constant 0 : index
    %4 = vector.load %arg3[%c0_3, %c0_4] : memref<8x128xf32, #tpu.memory_space<vmem>>, vector<8x128xf32>
    %cst_5 = arith.constant dense<0.000000e+00> : vector<8x32xf32>
    %5 = tpu.matmul %4, %3, %cst_5 {dimension_numbers = #tpu.dot_dimension_numbers<[1], [0], [0], [1], [0, 0, 1, 1], [], []>} : vector<8x128xf32>, vector<128x32xf32>, vector<8x32xf32> -> vector<8x32xf32>
    %cst_6 = arith.constant dense<0.000000e+00> : vector<8xf32>
    %6 = vector.multi_reduction <add>, %5, %cst_6 [1] : vector<8x32xf32> to vector<8xf32>
    %7 = vector.shape_cast %6 : vector<8xf32> to vector<8x1xf32>
    %cst_7 = arith.constant 3.200000e+01 : f32
    %8 = vector.broadcast %cst_7 : f32 to vector<8x1xf32>
    %9 = arith.divf %7, %8 : vector<8x1xf32>
    %10 = vector.broadcast %9 : vector<8x1xf32> to vector<8x32xf32>
    %11 = arith.subf %5, %10 : vector<8x32xf32>
    %12 = arith.mulf %11, %11 : vector<8x32xf32>
    %cst_8 = arith.constant dense<0.000000e+00> : vector<8xf32>
    %13 = vector.multi_reduction <add>, %12, %cst_8 [1] : vector<8x32xf32> to vector<8xf32>
    %14 = vector.shape_cast %13 : vector<8xf32> to vector<8x1xf32>
    %cst_9 = arith.constant 3.200000e+01 : f32
    %15 = vector.broadcast %cst_9 : f32 to vector<8x1xf32>
    %16 = arith.divf %14, %15 : vector<8x1xf32>
    %cst_10 = arith.constant 9.99999974E-6 : f32
    %17 = vector.broadcast %cst_10 : f32 to vector<8x1xf32>
    %18 = arith.addf %16, %17 : vector<8x1xf32>
    %19 = math.rsqrt %18 : vector<8x1xf32>
    %20 = vector.broadcast %19 : vector<8x1xf32> to vector<8x32xf32>
    %21 = arith.mulf %11, %20 : vector<8x32xf32>
    %cst_11 = arith.constant 0.000000e+00 : f32
    %22 = vector.broadcast %cst_11 : f32 to vector<8x32xf32>
    %23 = arith.maximumf %21, %22 : vector<8x32xf32>
    %c0_12 = arith.constant 0 : index
    %c0_13 = arith.constant 0 : index
    %24 = vector.load %arg4[%c0_12, %c0_13] : memref<128x8xf32, #tpu.memory_space<vmem>>, vector<128x8xf32>
    %25 = vector.extract_strided_slice %23 {offsets = [0, 0], sizes = [8, 16], strides = [1, 1]} : vector<8x32xf32> to vector<8x16xf32>
    %cst_14 = arith.constant dense<0.000000e+00> : vector<128x16xf32>
    %26 = tpu.matmul %24, %25, %cst_14 {dimension_numbers = #tpu.dot_dimension_numbers<[1], [0], [0], [1], [0, 0, 1, 1], [], []>} : vector<128x8xf32>, vector<8x16xf32>, vector<128x16xf32> -> vector<128x16xf32>
    %27 = arith.negf %26 : vector<128x16xf32>
    %28 = math.exp %27 : vector<128x16xf32>
    %cst_15 = arith.constant 1.000000e+00 : f32
    %29 = vector.broadcast %cst_15 : f32 to vector<128x16xf32>
    %30 = arith.addf %29, %28 : vector<128x16xf32>
    %31 = arith.divf %29, %30 : vector<128x16xf32>
    %c0_16 = arith.constant 0 : index
    %c0_17 = arith.constant 0 : index
    %32 = vector.load %arg5[%c0_16, %c0_17] : memref<128x8xf32, #tpu.memory_space<vmem>>, vector<128x8xf32>
    %33 = vector.extract_strided_slice %23 {offsets = [0, 16], sizes = [8, 16], strides = [1, 1]} : vector<8x32xf32> to vector<8x16xf32>
    %cst_18 = arith.constant dense<0.000000e+00> : vector<128x16xf32>
    %34 = tpu.matmul %32, %33, %cst_18 {dimension_numbers = #tpu.dot_dimension_numbers<[1], [0], [0], [1], [0, 0, 1, 1], [], []>} : vector<128x8xf32>, vector<8x16xf32>, vector<128x16xf32> -> vector<128x16xf32>
    %35 = arith.negf %34 : vector<128x16xf32>
    %36 = math.exp %35 : vector<128x16xf32>
    %cst_19 = arith.constant 1.000000e+00 : f32
    %37 = vector.broadcast %cst_19 : f32 to vector<128x16xf32>
    %38 = arith.addf %37, %36 : vector<128x16xf32>
    %39 = arith.divf %37, %38 : vector<128x16xf32>
    %c0_20 = arith.constant 0 : index
    %c0_21 = arith.constant 0 : index
    %40 = vector.load %arg1[%c0_20, %c0_21] : memref<128x256xf32, #tpu.memory_space<vmem>>, vector<128x256xf32>
    %41 = vector.shape_cast %40 : vector<128x256xf32> to vector<4x32x256xf32>
    %cst_22 = arith.constant dense<0.000000e+00> : vector<4x256xf32>
    %42 = vector.multi_reduction <add>, %41, %cst_22 [1] : vector<4x32x256xf32> to vector<4x256xf32>
    %cst_23 = arith.constant 3.200000e+01 : f32
    %43 = vector.broadcast %cst_23 : f32 to vector<4x256xf32>
    %44 = arith.divf %42, %43 : vector<4x256xf32>
    %cst_24 = arith.constant dense<0xFF800000> : vector<4x256xf32>
    %45 = vector.multi_reduction <maximumf>, %41, %cst_24 [1] : vector<4x32x256xf32> to vector<4x256xf32>
    %46 = tpu.concatenate %44, %45 in 1 : vector<4x256xf32>, vector<4x256xf32> -> vector<4x512xf32>
    %c0_25 = arith.constant 0 : index
    %c0_26 = arith.constant 0 : index
    %47 = vector.load %arg8[%c0_25, %c0_26] : memref<9x512xf32, #tpu.memory_space<vmem>>, vector<9x512xf32>
    %cst_27 = arith.constant 0.000000e+00 : f32
    %48 = vector.broadcast %cst_27 : f32 to vector<4x512xf32>
    %c17_i32 = arith.constant 17 : i32
    %49 = tpu.dynamic_rotate %46 by %c17_i32 dim 1 : vector<4x512xf32>, i32 -> vector<4x512xf32>
    %50 = vector.extract_strided_slice %47 {offsets = [0, 0], sizes = [1, 512], strides = [1, 1]} : vector<9x512xf32> to vector<1x512xf32>
    %51 = vector.broadcast %50 : vector<1x512xf32> to vector<4x512xf32>
    %52 = arith.mulf %49, %51 : vector<4x512xf32>
    %53 = arith.addf %48, %52 : vector<4x512xf32>
    %c16_i32 = arith.constant 16 : i32
    %54 = tpu.dynamic_rotate %46 by %c16_i32 dim 1 : vector<4x512xf32>, i32 -> vector<4x512xf32>
    %55 = vector.extract_strided_slice %47 {offsets = [1, 0], sizes = [1, 512], strides = [1, 1]} : vector<9x512xf32> to vector<1x512xf32>
    %56 = vector.broadcast %55 : vector<1x512xf32> to vector<4x512xf32>
    %57 = arith.mulf %54, %56 : vector<4x512xf32>
    %58 = arith.addf %53, %57 : vector<4x512xf32>
    %c15_i32 = arith.constant 15 : i32
    %59 = tpu.dynamic_rotate %46 by %c15_i32 dim 1 : vector<4x512xf32>, i32 -> vector<4x512xf32>
    %60 = vector.extract_strided_slice %47 {offsets = [2, 0], sizes = [1, 512], strides = [1, 1]} : vector<9x512xf32> to vector<1x512xf32>
    %61 = vector.broadcast %60 : vector<1x512xf32> to vector<4x512xf32>
    %62 = arith.mulf %59, %61 : vector<4x512xf32>
    %63 = arith.addf %58, %62 : vector<4x512xf32>
    %c1_i32 = arith.constant 1 : i32
    %64 = tpu.dynamic_rotate %46 by %c1_i32 dim 1 : vector<4x512xf32>, i32 -> vector<4x512xf32>
    %65 = vector.extract_strided_slice %47 {offsets = [3, 0], sizes = [1, 512], strides = [1, 1]} : vector<9x512xf32> to vector<1x512xf32>
    %66 = vector.broadcast %65 : vector<1x512xf32> to vector<4x512xf32>
    %67 = arith.mulf %64, %66 : vector<4x512xf32>
    %68 = arith.addf %63, %67 : vector<4x512xf32>
    %69 = vector.extract_strided_slice %47 {offsets = [4, 0], sizes = [1, 512], strides = [1, 1]} : vector<9x512xf32> to vector<1x512xf32>
    %70 = vector.broadcast %69 : vector<1x512xf32> to vector<4x512xf32>
    %71 = arith.mulf %46, %70 : vector<4x512xf32>
    %72 = arith.addf %68, %71 : vector<4x512xf32>
    %c511_i32 = arith.constant 511 : i32
    %73 = tpu.dynamic_rotate %46 by %c511_i32 dim 1 : vector<4x512xf32>, i32 -> vector<4x512xf32>
    %74 = vector.extract_strided_slice %47 {offsets = [5, 0], sizes = [1, 512], strides = [1, 1]} : vector<9x512xf32> to vector<1x512xf32>
    %75 = vector.broadcast %74 : vector<1x512xf32> to vector<4x512xf32>
    %76 = arith.mulf %73, %75 : vector<4x512xf32>
    %77 = arith.addf %72, %76 : vector<4x512xf32>
    %c497_i32 = arith.constant 497 : i32
    %78 = tpu.dynamic_rotate %46 by %c497_i32 dim 1 : vector<4x512xf32>, i32 -> vector<4x512xf32>
    %79 = vector.extract_strided_slice %47 {offsets = [6, 0], sizes = [1, 512], strides = [1, 1]} : vector<9x512xf32> to vector<1x512xf32>
    %80 = vector.broadcast %79 : vector<1x512xf32> to vector<4x512xf32>
    %81 = arith.mulf %78, %80 : vector<4x512xf32>
    %82 = arith.addf %77, %81 : vector<4x512xf32>
    %c496_i32 = arith.constant 496 : i32
    %83 = tpu.dynamic_rotate %46 by %c496_i32 dim 1 : vector<4x512xf32>, i32 -> vector<4x512xf32>
    %84 = vector.extract_strided_slice %47 {offsets = [7, 0], sizes = [1, 512], strides = [1, 1]} : vector<9x512xf32> to vector<1x512xf32>
    %85 = vector.broadcast %84 : vector<1x512xf32> to vector<4x512xf32>
    %86 = arith.mulf %83, %85 : vector<4x512xf32>
    %87 = arith.addf %82, %86 : vector<4x512xf32>
    %c495_i32 = arith.constant 495 : i32
    %88 = tpu.dynamic_rotate %46 by %c495_i32 dim 1 : vector<4x512xf32>, i32 -> vector<4x512xf32>
    %89 = vector.extract_strided_slice %47 {offsets = [8, 0], sizes = [1, 512], strides = [1, 1]} : vector<9x512xf32> to vector<1x512xf32>
    %90 = vector.broadcast %89 : vector<1x512xf32> to vector<4x512xf32>
    %91 = arith.mulf %88, %90 : vector<4x512xf32>
    %92 = arith.addf %87, %91 : vector<4x512xf32>
    %93 = vector.extract_strided_slice %92 {offsets = [0, 0], sizes = [4, 256], strides = [1, 1]} : vector<4x512xf32> to vector<4x256xf32>
    %94 = vector.extract_strided_slice %92 {offsets = [0, 256], sizes = [4, 256], strides = [1, 1]} : vector<4x512xf32> to vector<4x256xf32>
    %95 = arith.addf %93, %94 : vector<4x256xf32>
    %96 = arith.negf %95 : vector<4x256xf32>
    %97 = math.exp %96 : vector<4x256xf32>
    %cst_28 = arith.constant 1.000000e+00 : f32
    %98 = vector.broadcast %cst_28 : f32 to vector<4x256xf32>
    %99 = arith.addf %98, %97 : vector<4x256xf32>
    %100 = arith.divf %98, %99 : vector<4x256xf32>
    %101 = arith.truncf %31 : vector<128x16xf32> to vector<128x16xbf16>
    %c0_29 = arith.constant 0 : index
    %c0_30 = arith.constant 0 : index
    %102 = vector.load %arg6[%c0_29, %c0_30] : memref<16x256xbf16, #tpu.memory_space<vmem>>, vector<16x256xbf16>
    %cst_31 = arith.constant dense<0.000000e+00> : vector<128x256xf32>
    %103 = tpu.matmul %101, %102, %cst_31 {dimension_numbers = #tpu.dot_dimension_numbers<[1], [0], [0], [1], [0, 0, 1, 1], [], []>} : vector<128x16xbf16>, vector<16x256xbf16>, vector<128x256xf32> -> vector<128x256xf32>
    %104 = arith.truncf %39 : vector<128x16xf32> to vector<128x16xbf16>
    %c0_32 = arith.constant 0 : index
    %c0_33 = arith.constant 0 : index
    %105 = vector.load %arg7[%c0_32, %c0_33] : memref<16x256xbf16, #tpu.memory_space<vmem>>, vector<16x256xbf16>
    %cst_34 = arith.constant dense<0.000000e+00> : vector<128x256xf32>
    %106 = tpu.matmul %104, %105, %cst_34 {dimension_numbers = #tpu.dot_dimension_numbers<[1], [0], [0], [1], [0, 0, 1, 1], [], []>} : vector<128x16xbf16>, vector<16x256xbf16>, vector<128x256xf32> -> vector<128x256xf32>
    %107 = arith.mulf %103, %106 : vector<128x256xf32>
    %108 = vector.shape_cast %107 : vector<128x256xf32> to vector<4x32x256xf32>
    %109 = arith.mulf %41, %108 : vector<4x32x256xf32>
    %110 = vector.shape_cast %100 : vector<4x256xf32> to vector<4x1x256xf32>
    %111 = vector.broadcast %110 : vector<4x1x256xf32> to vector<4x32x256xf32>
    %112 = arith.mulf %109, %111 : vector<4x32x256xf32>
    %113 = vector.shape_cast %112 : vector<4x32x256xf32> to vector<128x256xf32>
    %c0_35 = arith.constant 0 : index
    %c0_36 = arith.constant 0 : index
    %114 = vector.load %arg9[%c0_35, %c0_36] : memref<128x256xf32, #tpu.memory_space<vmem>>, vector<128x256xf32>
    tpu.vector_store %arg9[%c0_35, %c0_36], %113 {strides = array<i32>} : memref<128x256xf32, #tpu.memory_space<vmem>>, vector<128x256xf32>,
    return
  }
  func.func @transform_0(%arg0: i32) -> (i32, i32) {
    %c0_i32 = arith.constant 0 : i32
    %c0_i32_0 = arith.constant 0 : i32
    return %arg0, %c0_i32 : i32, i32
  }
  func.func @transform_1(%arg0: i32) -> (i32, i32) {
    %c0_i32 = arith.constant 0 : i32
    %c0_i32_0 = arith.constant 0 : i32
    %c0_i32_1 = arith.constant 0 : i32
    return %c0_i32, %c0_i32_0 : i32, i32
  }
  func.func @transform_2(%arg0: i32) -> (i32, i32) {
    %c0_i32 = arith.constant 0 : i32
    %c0_i32_0 = arith.constant 0 : i32
    %c0_i32_1 = arith.constant 0 : i32
    return %c0_i32, %c0_i32_0 : i32, i32
  }
  func.func @transform_3(%arg0: i32) -> (i32, i32) {
    %c0_i32 = arith.constant 0 : i32
    %c0_i32_0 = arith.constant 0 : i32
    %c0_i32_1 = arith.constant 0 : i32
    return %c0_i32, %c0_i32_0 : i32, i32
  }
  func.func @transform_4(%arg0: i32) -> (i32, i32) {
    %c0_i32 = arith.constant 0 : i32
    %c0_i32_0 = arith.constant 0 : i32
    %c0_i32_1 = arith.constant 0 : i32
    return %c0_i32, %c0_i32_0 : i32, i32
  }
  func.func @transform_5(%arg0: i32) -> (i32, i32) {
    %c0_i32 = arith.constant 0 : i32
    %c0_i32_0 = arith.constant 0 : i32
    %c0_i32_1 = arith.constant 0 : i32
    return %c0_i32, %c0_i32_0 : i32, i32
  }
  func.func @transform_6(%arg0: i32) -> (i32, i32) {
    %c0_i32 = arith.constant 0 : i32
    %c0_i32_0 = arith.constant 0 : i32
    %c0_i32_1 = arith.constant 0 : i32
    return %c0_i32, %c0_i32_0 : i32, i32
  }
  func.func @transform_7(%arg0: i32) -> (i32, i32) {
    %c0_i32 = arith.constant 0 : i32
    %c0_i32_0 = arith.constant 0 : i32
    %c0_i32_1 = arith.constant 0 : i32
    return %c0_i32, %c0_i32_0 : i32, i32
  }
  func.func @transform_8(%arg0: i32) -> (i32, i32) {
    %c0_i32 = arith.constant 0 : i32
    %c0_i32_0 = arith.constant 0 : i32
    return %arg0, %c0_i32 : i32, i32
  }
}

</mosaic_0001>

<bundles_post_ra>
// kernel: tpu_custom_call.1
= control target key start
LH: loop header
LB: loop body
LE: loop exit
PB: predicated region body
PF: predicated region fallthrough
CT: control target
= control target key end

     0   :  { %s3652_s0 = inlined_call_operand.vmem [shape: f32[128,256], index: 0, kind: input, shape index: {}]   ;;  %s3653_s1 = inlined_call_operand.vmem [shape: bf16[256,32], index: 1, kind: input, shape index: {}]   ;;  %s3654_s2 = inlined_call_operand.vmem [shape: f32[8,128], index: 2, kind: input, shape index: {}]   ;;  %s3655_s3 = inlined_call_operand.vmem [shape: f32[128,8], index: 3, kind: input, shape index: {}]   ;;  %s3656_s4 = inlined_call_operand.vmem [shape: f32[128,8], index: 4, kind: input, shape index: {}]   ;;  %s3657_s5 = inlined_call_operand.vmem [shape: bf16[16,256], index: 5, kind: input, shape index: {}]   ;;  %s3658_s6 = inlined_call_operand.vmem [shape: bf16[16,256], index: 6, kind: input, shape index: {}]   ;;  %s3659_s7 = inlined_call_operand.vmem [shape: f32[9,512], index: 7, kind: input, shape index: {}]   ;;  %s3660_s8 = inlined_call_operand.hbm [shape: f32[128,256], index: 8, kind: output, shape index: {}]  }
   0x1   :  { %v2385_v0 = vld [vmem:[%s3653_s1 + $0x78] sm:$0xff]   ;;  %v2387_v2 = vld [vmem:[%s3653_s1 + $0x70] sm:$0xff]   ;;  %v2389_v4 = vld [vmem:[%s3653_s1 + $0x68] sm:$0xff]  }
   0x2   :  { %v2386_v1 = vld [vmem:[%s3653_s1 + $0x38] sm:$0xff]   ;;  %2169 = vmatprep.subr.bf16.mxu0 %v2385_v0  ;;  %v2388_v3 = vld [vmem:[%s3653_s1 + $0x30] sm:$0xff]   ;;  %v2390_v5 = vld [vmem:[%s3653_s1 + $0x28] sm:$0xff]  }
   0x3   :  { %2170 = vmatpush3.bf16.msra.mxu0 %v2386_v1  ;;  %v2391_v6 = vld [vmem:[%s3653_s1 + $0x60] sm:$0xff]   ;;  %v2393_v8 = vld [vmem:[%s3653_s1 + $0x58] sm:$0xff]   ;;  %v2395_v10 = vld [vmem:[%s3653_s1 + $0x50] sm:$0xff]  }
   0x4   :  { %2171 = vmatprep.subr.bf16.mxu0 %v2387_v2  ;;  %v2392_v7 = vld [vmem:[%s3653_s1 + $0x20] sm:$0xff]   ;;  %v2394_v9 = vld [vmem:[%s3653_s1 + $0x18] sm:$0xff]   ;;  %v2694_v11 = vld [vmem:[%s3652_s0 + $0x8] sm:$0xff] }
   0x5   :  { %v2699_v12 = vld [vmem:[%s3652_s0 + $0x18] sm:$0xff]  ;;  %v2396_v14 = vld [vmem:[%s3653_s1 + $0x10] sm:$0xff]   ;;  %v2397_v15 = vld [vmem:[%s3653_s1 + $0x48] sm:$0xff]  }
   0x6   :  { %v64_v13 = vpack.c.bf16 %v2699_v12, %v2694_v11  ;;  %v2398_v16 = vld [vmem:[%s3653_s1 + $0x8] sm:$0xff]   ;;  %v2399_v17 = vld [vmem:[%s3653_s1 + $0x40] sm:$0xff]  }
   0x7   :  { %2172 = vmatpush3.bf16.msra.mxu0 %v2388_v3  ;;  %v2400_v18 = vld [vmem:[%s3653_s1] sm:$0xff]  }
   0x8   :  { %2173 = vmatprep.subr.bf16.mxu0 %v2389_v4  ;;  %239 = vmatprep.mubr.bf16.mxu0 %v64_v13 }
   0xb   :  { %2174 = vmatpush3.bf16.msra.mxu0 %v2390_v5 }
   0xc   :  { %2175 = vmatprep.subr.bf16.mxu0 %v2391_v6 }
   0xf   :  { %2176 = vmatpush3.bf16.msra.mxu0 %v2392_v7 }
  0x10   :  { %2177 = vmatprep.subr.bf16.mxu0 %v2393_v8 }
  0x13   :  { %2178 = vmatpush3.bf16.msra.mxu0 %v2394_v9 }
  0x14   :  { %2179 = vmatprep.subr.bf16.mxu0 %v2395_v10 }
  0x17   :  { %2180 = vmatpush3.bf16.msra.mxu0 %v2396_v14 }
  0x18   :  { %2181 = vmatprep.subr.bf16.mxu0 %v2397_v15 }
  0x1b   :  { %2182 = vmatpush3.bf16.msra.mxu0 %v2398_v16 }
  0x1c   :  { %2183 = vmatprep.subr.bf16.mxu0 %v2399_v17 }
  0x1d   :  { %13 = vsyncpa [#allocation3], 0  ;;  %v2721_v19 = vld [vmem:[%s3652_s0 + $0x28] sm:$0xff]  ;;  %v2726_v20 = vld [vmem:[%s3652_s0 + $0x38] sm:$0xff]  ;;  %v2599_v0 = vmov 0.0   ;;  %vm2600_vm0 = vmmov 0  }
  0x1e   :  { %v2731_v21 = vld [vmem:[%s3652_s0] sm:$0xff]  ;;  %v2736_v22 = vld [vmem:[%s3652_s0 + $0x10] sm:$0xff]  ;;  %v66_v23 = vpack.c.bf16 %v2726_v20, %v2721_v19  ;;  %v2755_v27 = vld [vmem:[%s3652_s0 + $0x48] sm:$0xff]  ;;  %2284 = vmatprep.subr.mxu1 %v2599_v0  ;;  %2316 = vmatprep.mubr.msk.f32.mxu1 %vm2600_vm0, %v2599_v0  ;;  %vm375_vm1 = vcmask 261120   ;;  %vm407_vm2 = vcmask 64512   ;;  %s2601_s15 = smov 112  }
  0x1f   :  { %2184 = vmatpush3.bf16.msra.mxu0 %v2400_v18  ;;  %v63_v24 = vpack.c.bf16 %v2736_v22, %v2731_v21  ;;  %v2745_v25 = vld [vmem:[%s3652_s0 + $0x20] sm:$0xff]  ;;  %v2750_v26 = vld [vmem:[%s3652_s0 + $0x30] sm:$0xff]  ;;  %v2760_v28 = vld [vmem:[%s3652_s0 + $0x58] sm:$0xff]  ;;  %vm1166_vm3 = vcmask 1041409   ;;  %vm1168_vm4 = vcmask 1042434   ;;  %vm1170_vm5 = vcmask 1043459  }
  0x20   :  { %v65_v29 = vpack.c.bf16 %v2750_v26, %v2745_v25  ;;  %v68_v30 = vpack.c.bf16 %v2760_v28, %v2755_v27  ;;  %v2769_v31 = vld [vmem:[%s3652_s0 + $0x40] sm:$0xff]  ;;  %v2774_v32 = vld [vmem:[%s3652_s0 + $0x50] sm:$0xff]  ;;  %v2779_v33 = vld [vmem:[%s3652_s0 + $0x68] sm:$0xff]  ;;  %s2603_s10 = smov 17   ;;  %s2605_s30 = smov 15   ;;  %vm1557_vm6 = vcmask 130048  }
  0x21   :  { %v2784_v34 = vld [vmem:[%s3652_s0 + $0x78] sm:$0xff]  ;;  %v67_v35 = vpack.c.bf16 %v2774_v32, %v2769_v31  ;;  %v2793_v37 = vld [vmem:[%s3652_s0 + $0x60] sm:$0xff]  ;;  %v2798_v38 = vld [vmem:[%s3652_s0 + $0x70] sm:$0xff]  ;;  %s2606_s13 = smov 1   ;;  %s2609_s14 = smov 111  }
  0x22   :  { %240 = vmatmul.mubr.bf16.vlgmr.msra.gmra.mxu0 %v63_v24  ;;  %v70_v36 = vpack.c.bf16 %v2784_v34, %v2779_v33  ;;  %v2803_v39 = vld [vmem:[%s3652_s0 + $0x88] sm:$0xff]  ;;  %v2808_v40 = vld [vmem:[%s3652_s0 + $0x98] sm:$0xff]  ;;  %v69_v41 = vpack.c.bf16 %v2798_v38, %v2793_v37  ;;  %v2817_v43 = vld [vmem:[%s3652_s0 + $0x80] sm:$0xff]  ;;  %s2611_s11 = smov [#allocation2]  }
  0x23   :  { %247 = vmatprep.mubr.bf16.mxu0 %v66_v23  ;;  %v72_v42 = vpack.c.bf16 %v2808_v40, %v2803_v39  ;;  %v2822_v44 = vld [vmem:[%s3652_s0 + $0x90] sm:$0xff]  ;;  %v2827_v45 = vld [vmem:[%s3652_s0 + $0xa8] sm:$0xff]  ;;  %v2832_v46 = vld [vmem:[%s3652_s0 + $0xb8] sm:$0xff]  ;;  %s2052_s12 = sshll.u32 %s2611_s11, 4  ;;  %s2053_s12 = int_to_ptr.vmem [resolvable:$true] %s2052_s12 }
  0x24   :  { %v71_v47 = vpack.c.bf16 %v2822_v44, %v2817_v43  ;;  %v74_v48 = vpack.c.bf16 %v2832_v46, %v2827_v45  ;;  %v2841_v49 = vld [vmem:[%s3652_s0 + $0xa0] sm:$0xff]  ;;  %v2846_v50 = vld [vmem:[%s3652_s0 + $0xb0] sm:$0xff]  ;;  %v2851_v51 = vld [vmem:[%s3652_s0 + $0xc8] sm:$0xff]  ;;  %p2582_p1 = scmp.lt.s32.totalorder %s2053_s12, %s2053_s12 }
  0x25   :  { %v2856_v52 = vld [vmem:[%s3652_s0 + $0xd8] sm:$0xff]  ;;  %v73_v53 = vpack.c.bf16 %v2846_v50, %v2841_v49  ;;  %v2865_v55 = vld [vmem:[%s3652_s0 + $0xc0] sm:$0xff]  ;;  %v2870_v56 = vld [vmem:[%s3652_s0 + $0xd0] sm:$0xff] }
  0x26   :  { %v76_v54 = vpack.c.bf16 %v2856_v52, %v2851_v51  ;;  %v2875_v57 = vld [vmem:[%s3652_s0 + $0xe8] sm:$0xff]  ;;  %v2880_v58 = vld [vmem:[%s3652_s0 + $0xf8] sm:$0xff]  ;;  %v75_v59 = vpack.c.bf16 %v2870_v56, %v2865_v55  ;;  %v2889_v61 = vld [vmem:[%s3652_s0 + $0xe0] sm:$0xff] }
  0x27   :  { %3665 = vst [vmem:[#allocation5_spill] sm:$0xff] %v2880_v58  ;;  %v78_v60 = vpack.c.bf16 %v2880_v58, %v2875_v57  ;;  %v2894_v62 = vld [vmem:[%s3652_s0 + $0xf0] sm:$0xff] }
  0x28   :  { %3666 = vst [vmem:[#allocation6_spill] sm:$0xff] %v2894_v62  ;;  %v77_v63 = vpack.c.bf16 %v2894_v62, %v2889_v61 }
  0x2a   :  { %248 = vmatmul.mubr.bf16.gmra.mxu0 %v65_v29 }
  0x2b   :  { %255 = vmatprep.mubr.bf16.mxu0 %v68_v30 }
  0x32   :  { %256 = vmatmul.mubr.bf16.gmra.mxu0 %v67_v35 }
  0x33   :  { %263 = vmatprep.mubr.bf16.mxu0 %v70_v36 }
  0x3a   :  { %264 = vmatmul.mubr.bf16.gmra.mxu0 %v69_v41 }
  0x3b   :  { %271 = vmatprep.mubr.bf16.mxu0 %v72_v42 }
  0x42   :  { %272 = vmatmul.mubr.bf16.gmra.mxu0 %v71_v47 }
  0x43   :  { %279 = vmatprep.mubr.bf16.mxu0 %v74_v48 }
  0x4a   :  { %280 = vmatmul.mubr.bf16.gmra.mxu0 %v73_v53 }
  0x4b   :  { %287 = vmatprep.mubr.bf16.mxu0 %v76_v54 }
  0x52   :  { %288 = vmatmul.mubr.bf16.gmra.mxu0 %v75_v59 }
  0x53   :  { %295 = vmatprep.mubr.bf16.mxu0 %v78_v60 }
  0x5a   :  { %296 = vmatmul.mubr.bf16.gmra.mxu0 %v77_v63 }
  0xe2   :  { %v2185_v1 = vpop.f32.mrf.mxu0 }
  0xe4   :  { %v2186_v2 = vpop.f32.mrf.mxu0 }
  0xe5   :  { %v2900_v3 = vadd.f32 %v2186_v2, %v2185_v1 }
  0xe6   :  { %v2188_v4 = vpop.f32.mrf.mxu0 }
  0xe8   :  { %v2189_v5 = vpop.f32.mrf.mxu0 }
  0xe9   :  { %v2902_v6 = vadd.f32 %v2189_v5, %v2188_v4 }
  0xea   :  { %v2191_v7 = vpop.f32.mrf.mxu0 }
  0xec   :  { %v2192_v8 = vpop.f32.mrf.mxu0 }
  0xed   :  { %v2904_v9 = vadd.f32 %v2192_v8, %v2191_v7 }
  0xee   :  { %v2194_v10 = vpop.f32.mrf.mxu0 }
  0xf0   :  { %v2195_v13 = vpop.f32.mrf.mxu0 }
  0xf1   :  { %v2196_v14 = vadd.f32 %v2195_v13, %v2194_v10 }
  0xf2   :  { %v2197_v15 = vpop.f32.mrf.mxu0 }
  0xf4   :  { %v2198_v16 = vpop.f32.mrf.mxu0 }
  0xf5   :  { %v2199_v17 = vadd.f32 %v2198_v16, %v2197_v15 }
  0xf6   :  { %v2200_v18 = vpop.f32.mrf.mxu0 }
  0xf8   :  { %v2201_v23 = vpop.f32.mrf.mxu0 }
  0xfa   :  { %v2203_v24 = vpop.f32.mrf.mxu0 }
  0xfc   :  { %v2204_v29 = vpop.f32.mrf.mxu0 }
  0xfe   :  { %v2206_v30 = vpop.f32.mrf.mxu0 }
 0x100   :  { %v2207_v35 = vpop.f32.mrf.mxu0 }
 0x102   :  { %v2209_v36 = vpop.f32.mrf.mxu0 }
 0x104   :  { %v2210_v41 = vpop.f32.mrf.mxu0 }
 0x106   :  { %v2212_v42 = vpop.f32.mrf.mxu0 }
 0x108   :  { %v2213_v47 = vpop.f32.mrf.mxu0 }
 0x10a   :  { %v2215_v48 = vpop.f32.mrf.mxu0 }
 0x10c   :  { %v2216_v53 = vpop.f32.mrf.mxu0 }
 0x10d   :  { %v2217_v62 = vadd.f32 %v2216_v53, %v2215_v48  ;;  %v2202_v48 = vadd.f32 %v2201_v23, %v2200_v18  ;;  %v394_v53 = vld [vmem:[%s3655_s3 + $0x18] sm:$0xff] }
 0x10e   :  { %v2218_v54 = vpop.f32.mrf.mxu0 }
 0x110   :  { %v2219_v59 = vpop.f32.mrf.mxu0 }
 0x111   :  { %v2220_v58 = vadd.f32 %v2219_v59, %v2218_v54  ;;  %v2205_v54 = vadd.f32 %v2204_v29, %v2203_v24  ;;  %v395_v59 = vld [vmem:[%s3655_s3 + $0x20] sm:$0xff] }
 0x112   :  { %v2221_v60 = vpop.f32.mrf.mxu0 }
 0x114   :  { %v2222_v63 = vpop.f32.mrf.mxu0 }
 0x115   :  { %v2223_v16 = vadd.f32 %v2222_v63, %v2221_v60  ;;  %v2208_v60 = vadd.f32 %v2207_v35, %v2206_v30  ;;  %v396_v63 = vld [vmem:[%s3655_s3 + $0x28] sm:$0xff] }
 0x116   :  { %v2224_v1 = vpop.f32.mrf.mxu0 }
 0x118   :  { %v2225_v2 = vpop.f32.mrf.mxu0 }
 0x119   :  { %v2226_v15 = vadd.f32 %v2225_v2, %v2224_v1  ;;  %v2211_v1 = vadd.f32 %v2210_v41, %v2209_v36  ;;  %v397_v2 = vld [vmem:[%s3655_s3 + $0x30] sm:$0xff] }
 0x11a   :  { %v2227_v4 = vpop.f32.mrf.mxu0 }
 0x11c   :  { %v2228_v5 = vpop.f32.mrf.mxu0 }
 0x11d   :  { %v2229_v13 = vadd.f32 %v2228_v5, %v2227_v4  ;;  %v2214_v4 = vadd.f32 %v2213_v47, %v2212_v42  ;;  %v392_v42 = vld [vmem:[%s3655_s3 + $0x8] sm:$0xff]  ;;  %v393_v47 = vld [vmem:[%s3655_s3 + $0x10] sm:$0xff]  ;;  %v398_v5 = vld [vmem:[%s3655_s3 + $0x38] sm:$0xff] }
 0x11e   :  { %v2230_v7 = vpop.f32.mrf.mxu0 }
 0x120   :  { %v2231_v8 = vpop.f32.mrf.mxu0 }
 0x121   :  { %v2232_v10 = vadd.f32 %v2231_v8, %v2230_v7  ;;  %v399_v7 = vld [vmem:[%s3655_s3 + $0x40] sm:$0xff]  ;;  %v400_v8 = vld [vmem:[%s3655_s3 + $0x48] sm:$0xff] }
 0x123   :  { %2285 = vmatpush3.msra.mxu1 %v2232_v10  ;;  %v401_v10 = vld [vmem:[%s3655_s3 + $0x50] sm:$0xff] }
 0x124   :  { %2286 = vmatprep.subr.mxu1 %v2599_v0 }
 0x125   :  { %2287 = vmatpush3.msra.mxu1 %v2229_v13  ;;  %v402_v13 = vld [vmem:[%s3655_s3 + $0x58] sm:$0xff] }
 0x126   :  { %2288 = vmatprep.subr.mxu1 %v2599_v0 }
 0x127   :  { %2289 = vmatpush3.msra.mxu1 %v2226_v15  ;;  %v403_v15 = vld [vmem:[%s3655_s3 + $0x60] sm:$0xff] }
 0x128   :  { %2290 = vmatprep.subr.mxu1 %v2599_v0 }
 0x129   :  { %2291 = vmatpush3.msra.mxu1 %v2223_v16  ;;  %v404_v16 = vld [vmem:[%s3655_s3 + $0x68] sm:$0xff] }
 0x12a   :  { %2292 = vmatprep.subr.mxu1 %v2599_v0 }
 0x12b   :  { %2293 = vmatpush3.msra.mxu1 %v2220_v58  ;;  %v304_v58 = vld [vmem:[%s3654_s2] sm:$0xff]  ;;  %s2608_s2 = smov 113  }
 0x12c   :  { %2294 = vmatprep.subr.mxu1 %v2599_v0 }
 0x12d   :  { %2295 = vmatpush3.msra.mxu1 %v2217_v62 }
 0x12e   :  { %2296 = vmatprep.subr.mxu1 %v2599_v0 }
 0x12f   :  { %2297 = vmatpush3.msra.mxu1 %v2214_v4  ;;  %v405_v4 = vld [vmem:[%s3655_s3 + $0x70] sm:$0xff] }
 0x130   :  { %2298 = vmatprep.subr.mxu1 %v2599_v0 }
 0x131   :  { %2299 = vmatpush3.msra.mxu1 %v2211_v1  ;;  %v406_v1 = vld [vmem:[%s3655_s3 + $0x78] sm:$0xff] }
 0x132   :  { %2300 = vmatprep.subr.mxu1 %v2599_v0 }
 0x133   :  { %2301 = vmatpush3.msra.mxu1 %v2208_v60  ;;  %v697_v60 = vld [vmem:[%s3656_s4] sm:$0xff] }
 0x134   :  { %2302 = vmatprep.subr.mxu1 %v2599_v0 }
 0x135   :  { %2303 = vmatpush3.msra.mxu1 %v2205_v54  ;;  %v1015_v54 = vadd.f32 %v2699_v12, %v2694_v11 }
 0x136   :  { %2304 = vmatprep.subr.mxu1 %v2599_v0 }
 0x137   :  { %2305 = vmatpush3.msra.mxu1 %v2202_v48  ;;  %v1033_v48 = vadd.f32 %v2760_v28, %v2755_v27 }
 0x138   :  { %2306 = vmatprep.subr.mxu1 %v2599_v0 }
 0x139   :  { %2307 = vmatpush3.msra.mxu1 %v2199_v17 }
 0x13a   :  { %2308 = vmatprep.subr.mxu1 %v2599_v0 }
 0x13b   :  { %2309 = vmatpush3.msra.mxu1 %v2196_v14 }
 0x13c   :  { %2310 = vmatprep.subr.mxu1 %v2599_v0 }
 0x13d   :  { %2311 = vmatpush3.msra.mxu1 %v2904_v9 }
 0x13e   :  { %2312 = vmatprep.subr.mxu1 %v2599_v0 }
 0x13f   :  { %2313 = vmatpush3.msra.mxu1 %v2902_v6  ;;  %v391_v6 = vld [vmem:[%s3655_s3] sm:$0xff] }
 0x140   :  { %2314 = vmatprep.subr.mxu1 %v2599_v0 }
 0x141   :  { %2315 = vmatpush3.msra.mxu1 %v2900_v3 }
 0x142   :  { %2317 = vmatmul.mubr.f32.vlgmr.msra.gmra.mxu1 %v304_v58  ;;  %v1006_v58 = vadd.f32 %v2736_v22, %v2731_v21 }
 0x143   :  { %2321 = vmatprep.mubr.msk.f32.mxu1 %vm407_vm2, %v391_v6  ;;  %v1069_v6 = vadd.f32 %v2856_v52, %v2851_v51 }
 0x202   :  { %v371_v62 = vpop.f32.mrf.mxu1 }
 0x203   :  { %v376_v14 = vsel %vm375_vm1, %v371_v62, 0.0 }
 0x204   :  { %377 = vadd.xlane.f32.xlu0 %v376_v14  ;;  %v2318_v17 = vpop.f32.mrf.mxu1  ;;  %v1051_v14 = vadd.f32 %v2808_v40, %v2803_v39 }
 0x205   :  { %v1016_v17 = vadd.f32 %v1015_v54, %v2721_v19 }
 0x28d   :  { %v378_v18 = vpop.xlane.xlu0 %377 }
 0x28e   :  { %v380_v9 = vmul.f32 0.03125, %v378_v18  ;;  %v1034_v18 = vadd.f32 %v1033_v48, %v2779_v33 }
 0x290   :  { %v381_v23 = vsub.f32 %v371_v62, %v380_v9  ;;  %v1024_v62 = vadd.f32 %v2774_v32, %v2769_v31  ;;  %v1042_v9 = vadd.f32 %v2822_v44, %v2817_v43 }
 0x292   :  { %v382_v24 = vmul.f32 %v381_v23, %v381_v23 }
 0x294   :  { %v383_v29 = vsel %vm375_vm1, %v382_v24, 0.0  ;;  %v1025_v24 = vadd.f32 %v1024_v62, %v2793_v37 }
 0x295   :  { %384 = vadd.xlane.f32.xlu0 %v383_v29  ;;  %v1060_v29 = vadd.f32 %v2870_v56, %v2865_v55 }
 0x31e   :  { %v385_v0 = vpop.xlane.xlu0 %384 }
 0x31f   :  { %v386_v3 = vmul.f32 0.03125, %v385_v0  ;;  %v1052_v0 = vadd.f32 %v1051_v14, %v2827_v45 }
 0x321   :  { %v387_v30 = vadd.f32 1e-05, %v386_v3  ;;  %v1017_v3 = vadd.f32 %v1016_v17, %v2726_v20 }
 0x323   :  { %2407 = vrsqrt.f32 %v387_v30  ;;  %v1035_v30 = vadd.f32 %v1034_v18, %v2784_v34 }
 0x330   :  { %v2408_v35 = vpop.eup %2407 }
 0x331   :  { %v389_v36 = vmul.f32 %v2408_v35, %v381_v23  ;;  %v1007_v23 = vadd.f32 %v1006_v58, %v2745_v25  ;;  %v1043_v35 = vadd.f32 %v1042_v9, %v2841_v49 }
 0x333   :  { %v390_v41 = vmax.f32 %v389_v36, 0.0  ;;  %v1008_v36 = vadd.f32 %v1007_v23, %v2750_v26 }
 0x335   :  { %714 = vrot.lane.b32.xlu1 %v390_v41, %s2601_s15  ;;  %2319 = vmatprep.subr.mxu1 %v390_v41 }
 0x336   :  { %2320 = vmatpush3.msra.mxu1 %v390_v41  ;;  %v1026_v41 = vadd.f32 %v1025_v24, %v2798_v38 }
 0x337   :  { %2322 = vmatmul.mubr.msk.f32.vlgmr.msra.gmra.mxu1 %vm407_vm2, %v392_v42  ;;  %v1061_v42 = vadd.f32 %v1060_v29, %v2889_v61 }
 0x338   :  { %2324 = vmatprep.mubr.msk.f32.mxu1 %vm407_vm2, %v393_v47  ;;  %v1070_v47 = vadd.f32 %v1069_v6, %v2875_v57 }
 0x33b   :  { %2325 = vmatmul.mubr.msk.f32.gmra.mxu1 %vm407_vm2, %v394_v53  ;;  %v1053_v53 = vadd.f32 %v1052_v0, %v2832_v46 }
 0x33c   :  { %2327 = vmatprep.mubr.msk.f32.mxu1 %vm407_vm2, %v395_v59  ;;  %v1018_v59 = vrot.slane %v1017_v3, 4 }
 0x33f   :  { %2328 = vmatmul.mubr.msk.f32.gmra.mxu1 %vm407_vm2, %v396_v63  ;;  %v1036_v63 = vrot.slane %v1035_v30, 4 }
 0x340   :  { %2330 = vmatprep.mubr.msk.f32.mxu1 %vm407_vm2, %v397_v2  ;;  %v1044_v2 = vadd.f32 %v1043_v35, %v2846_v50 }
 0x343   :  { %2331 = vmatmul.mubr.msk.f32.gmra.mxu1 %vm407_vm2, %v398_v5  ;;  %v1009_v5 = vrot.slane %v1008_v36, 4 }
 0x344   :  { %2333 = vmatprep.mubr.msk.f32.mxu1 %vm407_vm2, %v399_v7  ;;  %v1027_v7 = vrot.slane %v1026_v41, 4 }
 0x345   :  { %v1010_v54 = vadd.f32 %v1009_v5, %v1008_v36 }
 0x346   :  { %v1028_v48 = vadd.f32 %v1027_v7, %v1026_v41 }
 0x347   :  { %2334 = vmatmul.mubr.msk.f32.gmra.mxu1 %vm407_vm2, %v400_v8  ;;  %v3667_v8 = vld [vmem:[#allocation6_spill] sm:$0xff]  ;;  %v1011_v23 = vrot.slane %v1010_v54, 2 }
 0x348   :  { %2336 = vmatprep.mubr.msk.f32.mxu1 %vm407_vm2, %v401_v10  ;;  %v1062_v10 = vadd.f32 %v1061_v42, %v3667_v8  ;;  %v1029_v24 = vrot.slane %v1028_v48, 2 }
 0x34a   :  { %v1063_v58 = vrot.slane %v1062_v10, 4 }
 0x34b   :  { %2337 = vmatmul.mubr.msk.f32.gmra.mxu1 %vm407_vm2, %v402_v13  ;;  %v3668_v13 = vld [vmem:[#allocation5_spill] sm:$0xff] }
 0x34c   :  { %2339 = vmatprep.mubr.msk.f32.mxu1 %vm407_vm2, %v403_v15  ;;  %v1071_v15 = vadd.f32 %v1070_v47, %v3668_v13  ;;  %v1064_v29 = vadd.f32 %v1063_v58, %v1062_v10  ;;  %v1012_v13 = vadd.f32 %v1011_v23, %v1010_v54 }
 0x34e   :  { %v1072_v62 = vrot.slane %v1071_v15, 4 }
 0x34f   :  { %2340 = vmatmul.mubr.msk.f32.gmra.mxu1 %vm407_vm2, %v404_v16  ;;  %v1054_v16 = vrot.slane %v1053_v53, 4 }
 0x350   :  { %2342 = vmatprep.mubr.msk.f32.mxu1 %vm407_vm2, %v405_v4  ;;  %v1019_v4 = vadd.f32 %v1018_v59, %v1017_v3  ;;  %v1073_v6 = vadd.f32 %v1072_v62, %v1071_v15  ;;  %v1030_v3 = vadd.f32 %v1029_v24, %v1028_v48 }
 0x351   :  { %v1055_v14 = vadd.f32 %v1054_v16, %v1053_v53  ;;  %v1013_v53 = vrot.slane %v1012_v13, 1 }
 0x352   :  { %v1020_v17 = vrot.slane %v1019_v4, 2  ;;  %v1074_v59 = vrot.slane %v1073_v6, 2  ;;  %v1031_v7 = vrot.slane %v1030_v3, 1 }
 0x353   :  { %2343 = vmatmul.mubr.msk.f32.gmra.mxu1 %vm407_vm2, %v406_v1  ;;  %v1037_v1 = vadd.f32 %v1036_v63, %v1035_v30  ;;  %v1056_v0 = vrot.slane %v1055_v14, 2  ;;  %v1065_v30 = vrot.slane %v1064_v29, 2  ;;  %v1014_v58 = vadd.f32 %v1013_v53, %v1012_v13  ;;  %v700_v53 = vld [vmem:[%s3656_s4 + $0x18] sm:$0xff] }
 0x354   :  { %2347 = vmatprep.mubr.msk.f32.mxu1 %vm407_vm2, %v697_v60  ;;  %v1045_v60 = vrot.slane %v1044_v2, 4  ;;  %v1021_v35 = vadd.f32 %v1020_v17, %v1019_v4  ;;  %v1032_v4 = vadd.f32 %v1031_v7, %v1030_v3  ;;  %v2401_v3 = vld [vmem:[%s3657_s5] ss:$8 sps:$4 sm:$0xff]   ;;  %v2602_v7 = vmov 0  }
 0x355   :  { %v1038_v18 = vrot.slane %v1037_v1, 2  ;;  %v1057_v36 = vadd.f32 %v1056_v0, %v1055_v14  ;;  %v1066_v16 = vadd.f32 %v1065_v30, %v1064_v29  ;;  %v1078_v14 = vmul.f32 0.03125, %v1014_v58  ;;  %v2403_v30 = vld [vmem:[%s3657_s5 + $0x4] ss:$8 sps:$4 sm:$0xff]   ;;  %1614 = vmatprep.mubr.bf16.mxu0 %v2602_v7 }
 0x356   :  { %v1046_v9 = vadd.f32 %v1045_v60, %v1044_v2  ;;  %v1022_v41 = vrot.slane %v1021_v35, 1  ;;  %v1075_v2 = vadd.f32 %v1074_v59, %v1073_v6  ;;  %v1080_v23 = vmul.f32 0.03125, %v1032_v4  ;;  %1596 = vmatprep.subr.bf16.mxu0 %v2403_v30  ;;  %v706_v58 = vld [vmem:[%s3656_s4 + $0x48] sm:$0xff]  ;;  %v707_v4 = vld [vmem:[%s3656_s4 + $0x50] sm:$0xff] }
 0x357   :  { %v1039_v42 = vadd.f32 %v1038_v18, %v1037_v1  ;;  %v1058_v60 = vrot.slane %v1057_v36, 1  ;;  %v1067_v1 = vrot.slane %v1066_v16, 1  ;;  %1597 = vmatpush1.bf16.msra.mxu0 %v2401_v3 }
 0x358   :  { %v1047_v47 = vrot.slane %v1046_v9, 2  ;;  %v1023_v8 = vadd.f32 %v1022_v41, %v1021_v35  ;;  %v1076_v62 = vrot.slane %v1075_v2, 1  ;;  %v1167_v13 = vsel %vm1166_vm3, %v1080_v23, %v1078_v14 }
 0x359   :  { %v1040_v63 = vrot.slane %v1039_v42, 1  ;;  %v1059_v54 = vadd.f32 %v1058_v60, %v1057_v36  ;;  %v1068_v24 = vadd.f32 %v1067_v1, %v1066_v16  ;;  %v699_v36 = vld [vmem:[%s3656_s4 + $0x10] sm:$0xff]  ;;  %v701_v16 = vld [vmem:[%s3656_s4 + $0x20] sm:$0xff]  ;;  %v708_v1 = vld [vmem:[%s3656_s4 + $0x58] sm:$0xff]  ;;  %v1113_v14 = vmax.f32 %v2755_v27, %v2760_v28 }
 0x35a   :  { %v1048_v5 = vadd.f32 %v1047_v47, %v1046_v9  ;;  %v1079_v48 = vmul.f32 0.03125, %v1023_v8  ;;  %v1077_v9 = vadd.f32 %v1076_v62, %v1075_v2  ;;  %v698_v8 = vld [vmem:[%s3656_s4 + $0x8] sm:$0xff]  ;;  %v703_v60 = vld [vmem:[%s3656_s4 + $0x30] sm:$0xff]  ;;  %v709_v62 = vld [vmem:[%s3656_s4 + $0x60] sm:$0xff]  ;;  %v1086_v23 = vmax.f32 %v2731_v21, %v2736_v22 }
 0x35b   :  { %v1041_v10 = vadd.f32 %v1040_v63, %v1039_v42  ;;  %v1083_v0 = vmul.f32 0.03125, %v1059_v54  ;;  %v1084_v35 = vmul.f32 0.03125, %v1068_v24  ;;  %v702_v2 = vld [vmem:[%s3656_s4 + $0x28] sm:$0xff]  ;;  %v1104_v24 = vmax.f32 %v2769_v31, %v2774_v32 }
 0x35c   :  { %v1049_v15 = vrot.slane %v1048_v5, 1  ;;  %v1085_v42 = vmul.f32 0.03125, %v1077_v9  ;;  %v710_v54 = vld [vmem:[%s3656_s4 + $0x68] sm:$0xff]  ;;  %v1087_v27 = vmax.f32 %v1086_v23, %v2745_v25  ;;  %v1140_v22 = vmax.f32 %v2865_v55, %v2870_v56  ;;  %v3670_v56 = vld [vmem:[#allocation5_spill] sm:$0xff] }
 0x35d   :  { %v1081_v17 = vmul.f32 0.03125, %v1041_v10  ;;  %v704_v10 = vld [vmem:[%s3656_s4 + $0x38] sm:$0xff]  ;;  %v1105_v21 = vmax.f32 %v1104_v24, %v2793_v37  ;;  %v1149_v28 = vmax.f32 %v2851_v51, %v2856_v52  ;;  %v3669_v55 = vld [vmem:[#allocation6_spill] sm:$0xff] }
 0x35e   :  { %v1050_v18 = vadd.f32 %v1049_v15, %v1048_v5  ;;  %v705_v15 = vld [vmem:[%s3656_s4 + $0x40] sm:$0xff]  ;;  %v1141_v37 = vmax.f32 %v1140_v22, %v2889_v61 }
 0x35f   :  { %v1172_v29 = vsel %vm1166_vm3, %v1081_v17, %v1079_v48  ;;  %v711_v48 = vld [vmem:[%s3656_s4 + $0x70] sm:$0xff]  ;;  %v712_v17 = vld [vmem:[%s3656_s4 + $0x78] sm:$0xff]  ;;  %v1106_v25 = vmax.f32 %v1105_v21, %v2798_v38  ;;  %s2604_s4 = smov 16  }
 0x360   :  { %v1082_v6 = vmul.f32 0.03125, %v1050_v18  ;;  %v1173_v59 = vsel %vm1168_vm4, %v1083_v0, %v1172_v29  ;;  %v1095_v18 = vmax.f32 %v2694_v11, %v2699_v12  ;;  %v1131_v0 = vmax.f32 %v2803_v39, %v2808_v40 }
 0x361   :  { %v3049_v5 = vsel %vm1170_vm5, %v1085_v42, %v1173_v59  ;;  %v1122_v11 = vmax.f32 %v2817_v43, %v2822_v44  ;;  %v1114_v12 = vmax.f32 %v1113_v14, %v2779_v33  ;;  %v1088_v33 = vmax.f32 %v1087_v27, %v2750_v26 }
 0x362   :  { %v1169_v41 = vsel %vm1168_vm4, %v1082_v6, %v1167_v13  ;;  %1203 = vrot.lane.b32.xlu0 %v3049_v5, %s2603_s10  ;;  %v1096_v9 = vmax.f32 %v1095_v18, %v2721_v19  ;;  %v1132_v31 = vmax.f32 %v1131_v0, %v2827_v45  ;;  %v1150_v40 = vmax.f32 %v1149_v28, %v2875_v57 }
 0x363   :  { %v3046_v63 = vsel %vm1170_vm5, %v1084_v35, %v1169_v41  ;;  %v1123_v32 = vmax.f32 %v1122_v11, %v2841_v49  ;;  %v1115_v39 = vmax.f32 %v1114_v12, %v2784_v34  ;;  %v1089_v52 = vrot.slane %v1088_v33, 4 }
 0x364   :  { %1201 = vrot.lane.b32.xlu1 %v3046_v63, %s2603_s10  ;;  %v1097_v19 = vmax.f32 %v1096_v9, %v2726_v20  ;;  %v1133_v44 = vmax.f32 %v1132_v31, %v2832_v46  ;;  %v1107_v45 = vrot.slane %v1106_v25, 4  ;;  %v1142_v49 = vmax.f32 %v1141_v37, %v3669_v55 }
 0x365   :  { %v1124_v51 = vmax.f32 %v1123_v32, %v2846_v50  ;;  %v1116_v20 = vrot.slane %v1115_v39, 4  ;;  %v1151_v34 = vmax.f32 %v1150_v40, %v3670_v56  ;;  %v1090_v13 = vmax.f32 %v1088_v33, %v1089_v52 }
 0x366   :  { %v1098_v43 = vrot.slane %v1097_v19, 4  ;;  %v1134_v26 = vrot.slane %v1133_v44, 4  ;;  %v1108_v61 = vmax.f32 %v1106_v25, %v1107_v45  ;;  %v1143_v35 = vrot.slane %v1142_v49, 4  ;;  %1277 = vrot.lane.b32.xlu0 %v3046_v63, %s2605_s30 }
 0x367   :  { %v1125_v6 = vrot.slane %v1124_v51, 4  ;;  %v1117_v38 = vmax.f32 %v1115_v39, %v1116_v20  ;;  %v1152_v57 = vrot.slane %v1151_v34, 4  ;;  %v1091_v50 = vrot.slane %v1090_v13, 2 }
 0x368   :  { %v1099_v29 = vmax.f32 %v1097_v19, %v1098_v43  ;;  %v1109_v3 = vrot.slane %v1108_v61, 2  ;;  %v1144_v30 = vmax.f32 %v1142_v49, %v1143_v35 }
 0x369   :  { %v1126_v46 = vmax.f32 %v1124_v51, %v1125_v6  ;;  %v1153_v59 = vmax.f32 %v1151_v34, %v1152_v57 }
 0x36a   :  { %v1100_v42 = vrot.slane %v1099_v29, 2 }
 0x3a7   :  { %v715_v47 = vpop.permute.xlu1 %714 }
 0x3a8   :  { %2345 = vmatprep.subr.mxu1 %v715_v47 }
 0x3a9   :  { %2346 = vmatpush3.msra.mxu1 %v715_v47  ;;  %v1135_v47 = vmax.f32 %v1133_v44, %v1134_v26 }
 0x3aa   :  { %2348 = vmatmul.mubr.msk.f32.vlgmr.msra.gmra.mxu1 %vm407_vm2, %v698_v8  ;;  %v1118_v8 = vrot.slane %v1117_v38, 2 }
 0x3ab   :  { %2350 = vmatprep.mubr.msk.f32.mxu1 %vm407_vm2, %v699_v36  ;;  %v1101_v36 = vmax.f32 %v1099_v29, %v1100_v42  ;;  %v1136_v41 = vrot.slane %v1135_v47, 2 }
 0x3ae   :  { %2351 = vmatmul.mubr.msk.f32.gmra.mxu1 %vm407_vm2, %v700_v53  ;;  %v1127_v53 = vrot.slane %v1126_v46, 2 }
 0x3af   :  { %2353 = vmatprep.mubr.msk.f32.mxu1 %vm407_vm2, %v701_v16  ;;  %v1119_v16 = vmax.f32 %v1117_v38, %v1118_v8  ;;  %v2404_v8 = vld [vmem:[%s3658_s6] ss:$8 sps:$4 sm:$0xff]  }
 0x3b2   :  { %2354 = vmatmul.mubr.msk.f32.gmra.mxu1 %vm407_vm2, %v702_v2  ;;  %v1092_v2 = vmax.f32 %v1090_v13, %v1091_v50 }
 0x3b3   :  { %2356 = vmatprep.mubr.msk.f32.mxu1 %vm407_vm2, %v703_v60  ;;  %v1110_v60 = vmax.f32 %v1108_v61, %v1109_v3 }
 0x3b6   :  { %2357 = vmatmul.mubr.msk.f32.gmra.mxu1 %vm407_vm2, %v704_v10  ;;  %v1145_v10 = vrot.slane %v1144_v30, 2 }
 0x3b7   :  { %2359 = vmatprep.mubr.msk.f32.mxu1 %vm407_vm2, %v705_v15  ;;  %v1154_v15 = vrot.slane %v1153_v59, 2 }
 0x3b9   :  { %v1155_v18 = vmax.f32 %v1153_v59, %v1154_v15 }
 0x3ba   :  { %2360 = vmatmul.mubr.msk.f32.gmra.mxu1 %vm407_vm2, %v706_v58  ;;  %v1102_v58 = vrot.slane %v1101_v36, 1 }
 0x3bb   :  { %2362 = vmatprep.mubr.msk.f32.mxu1 %vm407_vm2, %v707_v4  ;;  %v1137_v4 = vmax.f32 %v1135_v47, %v1136_v41  ;;  %v1156_v27 = vrot.slane %v1155_v18, 1  ;;  %v2406_v47 = vld [vmem:[%s3658_s6 + $0x4] ss:$8 sps:$4 sm:$0xff]   ;;  %s2607_s6 = smov 127  }
 0x3bc   :  { %v1103_v14 = vmax.f32 %v1101_v36, %v1102_v58  ;;  %1753 = vmatprep.subr.bf16.mxu1 %v2406_v47 }
 0x3bd   :  { %v1138_v23 = vrot.slane %v1137_v4, 1  ;;  %v1157_v32 = vmax.f32 %v1155_v18, %v1156_v27  ;;  %1754 = vmatpush1.bf16.msra.mxu1 %v2404_v8 }
 0x3be   :  { %2363 = vmatmul.mubr.msk.f32.gmra.mxu1 %vm407_vm2, %v708_v1  ;;  %v1128_v1 = vmax.f32 %v1126_v46, %v1127_v53 }
 0x3bf   :  { %2365 = vmatprep.mubr.msk.f32.mxu1 %vm407_vm2, %v709_v62  ;;  %v1120_v62 = vrot.slane %v1119_v16, 1  ;;  %v1139_v21 = vmax.f32 %v1137_v4, %v1138_v23 }
 0x3c0   :  { %v1129_v24 = vrot.slane %v1128_v1, 1 }
 0x3c1   :  { %v1121_v9 = vmax.f32 %v1119_v16, %v1120_v62 }
 0x3c2   :  { %2366 = vmatmul.mubr.msk.f32.gmra.mxu1 %vm407_vm2, %v710_v54  ;;  %v1093_v54 = vrot.slane %v1092_v2, 1  ;;  %v1130_v22 = vmax.f32 %v1128_v1, %v1129_v24 }
 0x3c3   :  { %2368 = vmatprep.mubr.msk.f32.mxu1 %vm407_vm2, %v711_v48  ;;  %v1111_v48 = vrot.slane %v1110_v60, 1  ;;  %v1188_v28 = vsel %vm1166_vm3, %v1121_v9, %v1103_v14 }
 0x3c4   :  { %v1094_v0 = vmax.f32 %v1092_v2, %v1093_v54  ;;  %v1189_v39 = vsel %vm1168_vm4, %v1139_v21, %v1188_v28 }
 0x3c5   :  { %v1112_v11 = vmax.f32 %v1110_v60, %v1111_v48  ;;  %v3152_v37 = vsel %vm1170_vm5, %v1157_v32, %v1189_v39 }
 0x3c6   :  { %2369 = vmatmul.mubr.msk.f32.gmra.mxu1 %vm407_vm2, %v712_v17  ;;  %v1146_v17 = vmax.f32 %v1144_v30, %v1145_v10 }
 0x3c7   :  { %1771 = vmatprep.mubr.bf16.mxu1 %v2602_v7  ;;  %v1185_v19 = vsel %vm1166_vm3, %v1112_v11, %v1094_v0 }
 0x3c8   :  { %v1147_v12 = vrot.slane %v1146_v17, 1  ;;  %v1186_v33 = vsel %vm1168_vm4, %v1130_v22, %v1185_v19 }
 0x3ca   :  { %v1148_v31 = vmax.f32 %v1146_v17, %v1147_v12 }
 0x3cc   :  { %v3147_v25 = vsel %vm1170_vm5, %v1148_v31, %v1186_v33 }
 0x3cd   :  { %1205 = vrot.lane.b32.xlu1 %v3147_v25, %s2603_s10  ;;  %1281 = vrot.lane.b32.xlu0 %v3147_v25, %s2605_s30 }
 0x3d1   :  { %1207 = vrot.lane.b32.xlu1 %v3152_v37, %s2603_s10  ;;  %1314 = vrot.lane.b32.xlu0 %v3046_v63, %s2606_s13 }
 0x3d5   :  { %1240 = vrot.lane.b32.xlu1 %v3046_v63, %s2604_s4  ;;  %1318 = vrot.lane.b32.xlu0 %v3147_v25, %s2606_s13 }
 0x3d9   :  { %1242 = vrot.lane.b32.xlu1 %v3049_v5, %s2604_s4  ;;  %1375 = vrot.lane.b32.xlu0 %v3046_v63, %s2607_s6 }
 0x3dd   :  { %1244 = vrot.lane.b32.xlu1 %v3147_v25, %s2604_s4  ;;  %1379 = vrot.lane.b32.xlu0 %v3147_v25, %s2607_s6 }
 0x3e1   :  { %1246 = vrot.lane.b32.xlu1 %v3152_v37, %s2604_s4  ;;  %1412 = vrot.lane.b32.xlu0 %v3046_v63, %s2608_s2 }
 0x3e5   :  { %1279 = vrot.lane.b32.xlu1 %v3049_v5, %s2605_s30  ;;  %1416 = vrot.lane.b32.xlu0 %v3147_v25, %s2608_s2 }
 0x3e9   :  { %1283 = vrot.lane.b32.xlu1 %v3152_v37, %s2605_s30  ;;  %1449 = vrot.lane.b32.xlu0 %v3046_v63, %s2601_s15 }
 0x3ed   :  { %1316 = vrot.lane.b32.xlu1 %v3049_v5, %s2606_s13  ;;  %1453 = vrot.lane.b32.xlu0 %v3147_v25, %s2601_s15 }
 0x3f1   :  { %1320 = vrot.lane.b32.xlu1 %v3152_v37, %s2606_s13  ;;  %1486 = vrot.lane.b32.xlu0 %v3046_v63, %s2609_s14 }
 0x3f5   :  { %1377 = vrot.lane.b32.xlu1 %v3049_v5, %s2607_s6  ;;  %1490 = vrot.lane.b32.xlu0 %v3147_v25, %s2609_s14 }
 0x3f7   :  { %v2323_v40 = vpop.f32.mrf.mxu1 }
 0x3f8   :  { %v2096_v43 = vmul.f32 -1.442695, %v2323_v40 }
 0x3f9   :  { %v522_v44 = vpop.f32.mrf.mxu1  ;;  %1381 = vrot.lane.b32.xlu1 %v3152_v37, %s2607_s6 }
 0x3fa   :  { %2409 = vpow2.f32 %v2096_v43  ;;  %v2095_v51 = vmul.f32 -1.442695, %v522_v44 }
 0x3fb   :  { %v2326_v20 = vpop.f32.mrf.mxu1 }
 0x3fc   :  { %2411 = vpow2.f32 %v2095_v51  ;;  %v2098_v52 = vmul.f32 -1.442695, %v2326_v20 }
 0x3fd   :  { %v532_v45 = vpop.f32.mrf.mxu1  ;;  %1414 = vrot.lane.b32.xlu1 %v3049_v5, %s2608_s2 }
 0x3fe   :  { %2413 = vpow2.f32 %v2098_v52  ;;  %v2097_v55 = vmul.f32 -1.442695, %v532_v45 }
 0x3ff   :  { %v2329_v49 = vpop.f32.mrf.mxu1 }
 0x400   :  { %2415 = vpow2.f32 %v2097_v55  ;;  %v2100_v56 = vmul.f32 -1.442695, %v2329_v49 }
 0x401   :  { %v542_v34 = vpop.f32.mrf.mxu1  ;;  %1418 = vrot.lane.b32.xlu1 %v3152_v37, %s2608_s2  ;;  %s2577_s2 = scalar_lea.vmem %s2053_s12, 4096 }
 0x402   :  { %v2099_v29 = vmul.f32 -1.442695, %v542_v34  ;;  %2417 = vpow2.f32 %v2100_v56  ;;  %p2578_p0 = scmp.ne.s32.totalorder %s2053_s12, %s2577_s2  ;;  %p2583_p2 = scmp.lt.s32.totalorder %s2577_s2, %s2577_s2 }
 0x403   :  { %v2332_v26 = vpop.f32.mrf.mxu1 }
 0x404   :  { %2419 = vpow2.f32 %v2099_v29  ;;  %v2102_v6 = vmul.f32 -1.442695, %v2332_v26  ;;  %p2584_p3 = por %p2583_p2, %p2582_p1 }
 0x405   :  { %v552_v38 = vpop.f32.mrf.mxu1  ;;  %1451 = vrot.lane.b32.xlu1 %v3049_v5, %s2601_s15 }
 0x406   :  { %v2101_v61 = vmul.f32 -1.442695, %v552_v38  ;;  %2421 = vpow2.f32 %v2102_v6  ;;  %p2585_p4 = pnand %p2584_p3, %p2578_p0 }
 0x407   :  { %v2410_v13 = vpop.eup %2409  ;;  %v2335_v42 = vpop.f32.mrf.mxu1 }
 0x408   :  { %v650_v35 = vadd.f32 1.0, %v2410_v13  ;;  %v2104_v41 = vmul.f32 -1.442695, %v2335_v42 }
 0x409   :  { %v2412_v57 = vpop.eup %2411  ;;  %v562_v59 = vpop.f32.mrf.mxu1  ;;  %1455 = vrot.lane.b32.xlu1 %v3152_v37, %s2601_s15 }
 0x40a   :  { %2423 = vrcp.f32 %v650_v35  ;;  %v649_v46 = vadd.f32 1.0, %v2412_v57  ;;  %v2103_v16 = vmul.f32 -1.442695, %v562_v59 }
 0x40b   :  { %v2414_v50 = vpop.eup %2413  ;;  %2425 = vpow2.f32 %v2101_v61  ;;  %v2338_v60 = vpop.f32.mrf.mxu1 }
 0x40c   :  { %2427 = vrcp.f32 %v649_v46  ;;  %v652_v3 = vadd.f32 1.0, %v2414_v50  ;;  %v2106_v62 = vmul.f32 -1.442695, %v2338_v60 }
 0x40d   :  { %v2416_v30 = vpop.eup %2415  ;;  %v572_v58 = vpop.f32.mrf.mxu1  ;;  %1488 = vrot.lane.b32.xlu1 %v3049_v5, %s2609_s14 }
 0x40e   :  { %v651_v36 = vadd.f32 1.0, %v2416_v30  ;;  %2429 = vrcp.f32 %v652_v3  ;;  %v2105_v48 = vmul.f32 -1.442695, %v572_v58 }
 0x40f   :  { %v2418_v53 = vpop.eup %2417  ;;  %v2341_v18 = vpop.f32.mrf.mxu1 }
 0x410   :  { %2431 = vrcp.f32 %v651_v36  ;;  %v654_v10 = vadd.f32 1.0, %v2418_v53  ;;  %v2108_v12 = vmul.f32 -1.442695, %v2341_v18 }
 0x411   :  { %v2420_v2 = vpop.eup %2419  ;;  %2433 = vpow2.f32 %v2104_v41  ;;  %v582_v11 = vpop.f32.mrf.mxu1  ;;  %1492 = vrot.lane.b32.xlu1 %v3152_v37, %s2609_s14 }
 0x412   :  { %v653_v15 = vadd.f32 1.0, %v2420_v2  ;;  %2435 = vpow2.f32 %v2103_v16  ;;  %v2107_v21 = vmul.f32 -1.442695, %v582_v11 }
 0x413   :  { %v2422_v4 = vpop.eup %2421  ;;  %2437 = vrcp.f32 %v654_v10  ;;  %v2344_v19 = vpop.f32.mrf.mxu1 }
 0x414   :  { %2439 = vrcp.f32 %v653_v15  ;;  %v656_v23 = vadd.f32 1.0, %v2422_v4  ;;  %v2110_v43 = vmul.f32 -1.442695, %v2344_v19 }
 0x415   :  { %2441 = vpow2.f32 %v2106_v62  ;;  %v592_v40 = vpop.f32.mrf.mxu1 }
 0x416   :  { %2443 = vpow2.f32 %v2105_v48  ;;  %v2109_v51 = vmul.f32 -1.442695, %v592_v40 }
 0x417   :  { %v2424_v1 = vpop.eup %2423  ;;  %2445 = vrcp.f32 %v656_v23 }
 0x418   :  { %v2426_v54 = vpop.eup %2425 }
 0x419   :  { %v2428_v17 = vpop.eup %2427  ;;  %v655_v9 = vadd.f32 1.0, %v2426_v54 }
 0x41a   :  { %v1537_v14 = vpack.c.bf16 %v2424_v1, %v2428_v17 }
 0x41b   :  { %v2430_v24 = vpop.eup %2429  ;;  %2447 = vrcp.f32 %v655_v9 }
 0x41c   :  { %2151 = vmatmul.mubr.msk.bf16.vlgmr.msra.gmra.mxu0 %vm1557_vm6, %v1537_v14  ;;  %2449 = vpow2.f32 %v2108_v12 }
 0x41d   :  { %v2432_v0 = vpop.eup %2431  ;;  %1624 = vmatprep.mubr.bf16.mxu0 %v2602_v7  ;;  %2451 = vpow2.f32 %v2107_v21 }
 0x41e   :  { %v2434_v27 = vpop.eup %2433  ;;  %v1538_v22 = vpack.c.bf16 %v2430_v24, %v2432_v0 }
 0x41f   :  { %v2436_v28 = vpop.eup %2435  ;;  %v658_v31 = vadd.f32 1.0, %v2434_v27 }
 0x420   :  { %v2438_v32 = vpop.eup %2437  ;;  %v657_v39 = vadd.f32 1.0, %v2436_v28 }
 0x421   :  { %v2440_v33 = vpop.eup %2439  ;;  %2453 = vrcp.f32 %v658_v31 }
 0x422   :  { %v2442_v44 = vpop.eup %2441  ;;  %2455 = vrcp.f32 %v657_v39  ;;  %v1539_v20 = vpack.c.bf16 %v2438_v32, %v2440_v33 }
 0x423   :  { %v2444_v52 = vpop.eup %2443  ;;  %v660_v45 = vadd.f32 1.0, %v2442_v44  ;;  %2457 = vpow2.f32 %v2110_v43 }
 0x424   :  { %2152 = vmatmul.mubr.msk.bf16.gmra.mxu0 %vm1557_vm6, %v1538_v22  ;;  %v2446_v55 = vpop.eup %2445  ;;  %v659_v49 = vadd.f32 1.0, %v2444_v52  ;;  %2459 = vpow2.f32 %v2109_v51 }
 0x425   :  { %1634 = vmatprep.mubr.bf16.mxu0 %v2602_v7  ;;  %2461 = vrcp.f32 %v660_v45 }
 0x426   :  { %2463 = vrcp.f32 %v659_v49 }
 0x428   :  { %v2448_v56 = vpop.eup %2447 }
 0x429   :  { %v2450_v34 = vpop.eup %2449  ;;  %v1540_v29 = vpack.c.bf16 %v2446_v55, %v2448_v56 }
 0x42a   :  { %v2452_v26 = vpop.eup %2451  ;;  %v662_v6 = vadd.f32 1.0, %v2450_v34 }
 0x42b   :  { %v661_v13 = vadd.f32 1.0, %v2452_v26 }
 0x42c   :  { %2153 = vmatmul.mubr.msk.bf16.gmra.mxu0 %vm1557_vm6, %v1539_v20  ;;  %2465 = vrcp.f32 %v662_v6 }
 0x42d   :  { %1644 = vmatprep.mubr.bf16.mxu0 %v2602_v7  ;;  %2467 = vrcp.f32 %v661_v13 }
 0x42e   :  { %v2454_v38 = vpop.eup %2453 }
 0x42f   :  { %v2456_v61 = vpop.eup %2455 }
 0x430   :  { %v2458_v35 = vpop.eup %2457  ;;  %v1541_v57 = vpack.c.bf16 %v2454_v38, %v2456_v61 }
 0x431   :  { %v2460_v42 = vpop.eup %2459  ;;  %v664_v47 = vadd.f32 1.0, %v2458_v35 }
 0x432   :  { %v2462_v46 = vpop.eup %2461  ;;  %v663_v8 = vadd.f32 1.0, %v2460_v42 }
 0x433   :  { %v2464_v50 = vpop.eup %2463  ;;  %2469 = vrcp.f32 %v664_v47 }
 0x434   :  { %2154 = vmatmul.mubr.msk.bf16.gmra.mxu0 %vm1557_vm6, %v1540_v29  ;;  %2471 = vrcp.f32 %v663_v8  ;;  %v1542_v3 = vpack.c.bf16 %v2462_v46, %v2464_v50 }
 0x435   :  { %1654 = vmatprep.mubr.bf16.mxu0 %v2602_v7 }
 0x439   :  { %v2466_v30 = vpop.eup %2465 }
 0x43a   :  { %v2468_v59 = vpop.eup %2467 }
 0x43b   :  { %v1543_v36 = vpack.c.bf16 %v2466_v30, %v2468_v59 }
 0x43c   :  { %2155 = vmatmul.mubr.msk.bf16.gmra.mxu0 %vm1557_vm6, %v1541_v57 }
 0x43d   :  { %1664 = vmatprep.mubr.bf16.mxu0 %v2602_v7 }
 0x440   :  { %v2470_v41 = vpop.eup %2469 }
 0x441   :  { %v2472_v53 = vpop.eup %2471 }
 0x442   :  { %v1544_v16 = vpack.c.bf16 %v2470_v41, %v2472_v53 }
 0x444   :  { %2156 = vmatmul.mubr.msk.bf16.gmra.mxu0 %vm1557_vm6, %v1542_v3 }
 0x445   :  { %1674 = vmatprep.mubr.bf16.mxu0 %v2602_v7 }
 0x44c   :  { %2157 = vmatmul.mubr.msk.bf16.gmra.mxu0 %vm1557_vm6, %v1543_v36 }
 0x44d   :  { %1684 = vmatprep.mubr.bf16.mxu0 %v2602_v7 }
 0x454   :  { %2158 = vmatmul.mubr.msk.bf16.gmra.mxu0 %vm1557_vm6, %v1544_v16 }
 0x46a   :  { %v2349_v2 = vpop.f32.mrf.mxu1 }
 0x46b   :  { %v2128_v60 = vmul.f32 -1.442695, %v2349_v2 }
 0x46c   :  { %v831_v10 = vpop.f32.mrf.mxu1 }
 0x46d   :  { %2473 = vpow2.f32 %v2128_v60  ;;  %v2127_v15 = vmul.f32 -1.442695, %v831_v10 }
 0x46e   :  { %v2352_v58 = vpop.f32.mrf.mxu1 }
 0x46f   :  { %2475 = vpow2.f32 %v2127_v15  ;;  %v2130_v4 = vmul.f32 -1.442695, %v2352_v58  ;;  %v3217_v15 = vpop.permute.xlu1 %1201 }
 0x470   :  { %v841_v1 = vpop.f32.mrf.mxu1 }
 0x471   :  { %2477 = vpow2.f32 %v2130_v4  ;;  %v2129_v62 = vmul.f32 -1.442695, %v841_v1 }
 0x472   :  { %v2355_v54 = vpop.f32.mrf.mxu1 }
 0x473   :  { %2479 = vpow2.f32 %v2129_v62  ;;  %v2132_v48 = vmul.f32 -1.442695, %v2355_v54 }
 0x474   :  { %v851_v17 = vpop.f32.mrf.mxu1 }
 0x475   :  { %v2131_v18 = vmul.f32 -1.442695, %v851_v17  ;;  %2481 = vpow2.f32 %v2132_v48  ;;  %v3221_v48 = vpop.permute.xlu1 %1205 }
 0x476   :  { %v2358_v14 = vpop.f32.mrf.mxu1 }
 0x477   :  { %2483 = vpow2.f32 %v2131_v18  ;;  %v2134_v11 = vmul.f32 -1.442695, %v2358_v14 }
 0x478   :  { %v861_v24 = vpop.f32.mrf.mxu1 }
 0x479   :  { %v2133_v27 = vmul.f32 -1.442695, %v861_v24 }
 0x47a   :  { %v2474_v23 = vpop.eup %2473  ;;  %v2361_v22 = vpop.f32.mrf.mxu1 }
 0x47b   :  { %v959_v9 = vadd.f32 1.0, %v2474_v23  ;;  %v2136_v39 = vmul.f32 -1.442695, %v2361_v22 }
 0x47c   :  { %v2476_v0 = vpop.eup %2475  ;;  %v871_v32 = vpop.f32.mrf.mxu1 }
 0x47d   :  { %v958_v12 = vadd.f32 1.0, %v2476_v0  ;;  %2485 = vrcp.f32 %v959_v9  ;;  %v2135_v40 = vmul.f32 -1.442695, %v871_v32  ;;  %v3225_v0 = vpop.permute.xlu1 %1207 }
 0x47e   :  { %v2478_v21 = vpop.eup %2477  ;;  %v2364_v44 = vpop.f32.mrf.mxu1 }
 0x47f   :  { %2487 = vrcp.f32 %v958_v12  ;;  %v961_v19 = vadd.f32 1.0, %v2478_v21  ;;  %v2138_v49 = vmul.f32 -1.442695, %v2364_v44 }
 0x480   :  { %v2480_v28 = vpop.eup %2479  ;;  %2489 = vpow2.f32 %v2134_v11  ;;  %v881_v52 = vpop.f32.mrf.mxu1 }
 0x481   :  { %v960_v31 = vadd.f32 1.0, %v2480_v28  ;;  %2491 = vpow2.f32 %v2133_v27  ;;  %v2137_v29 = vmul.f32 -1.442695, %v881_v52  ;;  %v3228_v22 = vpop.permute.xlu1 %1240 }
 0x482   :  { %2493 = vrcp.f32 %v961_v19  ;;  %v2482_v33 = vpop.eup %2481  ;;  %v2367_v6 = vpop.f32.mrf.mxu1 }
 0x483   :  { %2495 = vrcp.f32 %v960_v31  ;;  %v963_v51 = vadd.f32 1.0, %v2482_v33  ;;  %v2140_v42 = vmul.f32 -1.442695, %v2367_v6 }
 0x484   :  { %v2484_v43 = vpop.eup %2483  ;;  %2497 = vpow2.f32 %v2136_v39  ;;  %v891_v57 = vpop.f32.mrf.mxu1 }
 0x485   :  { %v962_v20 = vadd.f32 1.0, %v2484_v43  ;;  %2499 = vpow2.f32 %v2135_v40  ;;  %v2139_v8 = vmul.f32 -1.442695, %v891_v57  ;;  %v1243_v33 = vpop.permute.xlu1 %1242 }
 0x486   :  { %2501 = vrcp.f32 %v963_v51  ;;  %v2370_v3 = vpop.f32.mrf.mxu1 }
 0x487   :  { %2503 = vrcp.f32 %v962_v20  ;;  %v2142_v16 = vmul.f32 -1.442695, %v2370_v3 }
 0x488   :  { %2505 = vpow2.f32 %v2138_v49  ;;  %v901_v53 = vpop.f32.mrf.mxu1 }
 0x489   :  { %2507 = vpow2.f32 %v2137_v29  ;;  %v2141_v10 = vmul.f32 -1.442695, %v901_v53  ;;  %v1245_v44 = vpop.permute.xlu1 %1244 }
 0x48a   :  { %v2486_v45 = vpop.eup %2485 }
 0x48c   :  { %v2488_v55 = vpop.eup %2487 }
 0x48d   :  { %v2490_v56 = vpop.eup %2489  ;;  %v1695_v34 = vpack.c.bf16 %v2486_v45, %v2488_v55  ;;  %v1247_v52 = vpop.permute.xlu1 %1246 }
 0x48e   :  { %v2492_v26 = vpop.eup %2491  ;;  %v965_v38 = vadd.f32 1.0, %v2490_v56  ;;  %v1204_v45 = vpop.permute.xlu0 %1203 }
 0x48f   :  { %2161 = vmatmul.mubr.msk.bf16.vlgmr.msra.gmra.mxu1 %vm1557_vm6, %v1695_v34  ;;  %v2494_v13 = vpop.eup %2493  ;;  %v964_v61 = vadd.f32 1.0, %v2492_v26 }
 0x490   :  { %1781 = vmatprep.mubr.bf16.mxu1 %v2602_v7  ;;  %v2496_v35 = vpop.eup %2495  ;;  %2509 = vrcp.f32 %v965_v38 }
 0x491   :  { %v2498_v47 = vpop.eup %2497  ;;  %2511 = vrcp.f32 %v964_v61  ;;  %v1696_v46 = vpack.c.bf16 %v2494_v13, %v2496_v35  ;;  %v3236_v56 = vpop.permute.xlu1 %1279 }
 0x492   :  { %v2500_v50 = vpop.eup %2499  ;;  %v967_v30 = vadd.f32 1.0, %v2498_v47  ;;  %2513 = vpow2.f32 %v2140_v42  ;;  %v1278_v34 = vpop.permute.xlu0 %1277 }
 0x493   :  { %v2502_v59 = vpop.eup %2501  ;;  %v966_v36 = vadd.f32 1.0, %v2500_v50  ;;  %2515 = vpow2.f32 %v2139_v8  ;;  %v3261_v50 = vld [vmem:[%s3659_s7 + $0x8] sm:$0xff] }
 0x494   :  { %v2504_v41 = vpop.eup %2503  ;;  %2517 = vrcp.f32 %v967_v30 }
 0x495   :  { %v2506_v2 = vpop.eup %2505  ;;  %2519 = vrcp.f32 %v966_v36  ;;  %v1697_v60 = vpack.c.bf16 %v2502_v59, %v2504_v41  ;;  %v1284_v29 = vpop.permute.xlu1 %1283  ;;  %v3272_v59 = vld [vmem:[%s3659_s7 + $0x18] sm:$0xff]  ;;  %v3277_v36 = vld [vmem:[%s3659_s7] sm:$0xff]  ;;  %v3282_v41 = vld [vmem:[%s3659_s7 + $0x10] sm:$0xff] }
 0x496   :  { %v2508_v58 = vpop.eup %2507  ;;  %v969_v4 = vadd.f32 1.0, %v2506_v2  ;;  %2521 = vpow2.f32 %v2142_v16  ;;  %v1282_v26 = vpop.permute.xlu0 %1281 }
 0x497   :  { %2162 = vmatmul.mubr.msk.bf16.gmra.mxu1 %vm1557_vm6, %v1696_v46  ;;  %v968_v62 = vadd.f32 1.0, %v2508_v58  ;;  %2523 = vpow2.f32 %v2141_v10 }
 0x498   :  { %1791 = vmatprep.mubr.bf16.mxu1 %v2602_v7  ;;  %2525 = vrcp.f32 %v969_v4 }
 0x499   :  { %2527 = vrcp.f32 %v968_v62  ;;  %v3238_v6 = vpop.permute.xlu1 %1316 }
 0x49a   :  { %v3240_v38 = vpop.permute.xlu0 %1314 }
 0x49d   :  { %v2510_v1 = vpop.eup %2509  ;;  %v3242_v13 = vpop.permute.xlu1 %1320 }
 0x49e   :  { %v2512_v54 = vpop.eup %2511  ;;  %v3244_v61 = vpop.permute.xlu0 %1318 }
 0x49f   :  { %2163 = vmatmul.mubr.msk.bf16.gmra.mxu1 %vm1557_vm6, %v1697_v60  ;;  %v2514_v17 = vpop.eup %2513  ;;  %v1698_v18 = vpack.c.bf16 %v2510_v1, %v2512_v54 }
 0x4a0   :  { %1801 = vmatprep.mubr.bf16.mxu1 %v2602_v7  ;;  %v2516_v14 = vpop.eup %2515  ;;  %v971_v23 = vadd.f32 1.0, %v2514_v17 }
 0x4a1   :  { %v2518_v24 = vpop.eup %2517  ;;  %v970_v9 = vadd.f32 1.0, %v2516_v14  ;;  %v3246_v35 = vpop.permute.xlu1 %1377 }
 0x4a2   :  { %v2520_v11 = vpop.eup %2519  ;;  %2529 = vrcp.f32 %v971_v23  ;;  %v3248_v57 = vpop.permute.xlu0 %1375 }
 0x4a3   :  { %v2522_v12 = vpop.eup %2521  ;;  %2531 = vrcp.f32 %v970_v9  ;;  %v1699_v27 = vpack.c.bf16 %v2518_v24, %v2520_v11 }
 0x4a4   :  { %v2524_v21 = vpop.eup %2523  ;;  %v973_v28 = vadd.f32 1.0, %v2522_v12 }
 0x4a5   :  { %v2526_v19 = vpop.eup %2525  ;;  %v972_v31 = vadd.f32 1.0, %v2524_v21  ;;  %v3252_v47 = vpop.permute.xlu1 %1381 }
 0x4a6   :  { %v2528_v32 = vpop.eup %2527  ;;  %2533 = vrcp.f32 %v973_v28  ;;  %v3254_v46 = vpop.permute.xlu0 %1379 }
 0x4a7   :  { %2164 = vmatmul.mubr.msk.bf16.gmra.mxu1 %vm1557_vm6, %v1698_v18  ;;  %2535 = vrcp.f32 %v972_v31  ;;  %v1700_v39 = vpack.c.bf16 %v2526_v19, %v2528_v32 }
 0x4a8   :  { %1811 = vmatprep.mubr.bf16.mxu1 %v2602_v7 }
 0x4a9   :  { %v3301_v1 = vpop.permute.xlu1 %1414 }
 0x4aa   :  { %v3303_v62 = vpop.permute.xlu0 %1412 }
 0x4af   :  { %2165 = vmatmul.mubr.msk.bf16.gmra.mxu1 %vm1557_vm6, %v1699_v27  ;;  %v2530_v40 = vpop.eup %2529 }
 0x4b0   :  { %1821 = vmatprep.mubr.bf16.mxu1 %v2602_v7  ;;  %v2532_v43 = vpop.eup %2531 }
 0x4b1   :  { %v1701_v51 = vpack.c.bf16 %v2530_v40, %v2532_v43 }
 0x4b3   :  { %v2534_v20 = vpop.eup %2533 }
 0x4b4   :  { %v2536_v55 = vpop.eup %2535 }
 0x4b5   :  { %v1702_v49 = vpack.c.bf16 %v2534_v20, %v2536_v55  ;;  %v3343_v20 = vpop.permute.xlu0 %1416 }
 0x4b7   :  { %2166 = vmatmul.mubr.msk.bf16.gmra.mxu1 %vm1557_vm6, %v1700_v39 }
 0x4b8   :  { %1831 = vmatprep.mubr.bf16.mxu1 %v2602_v7 }
 0x4bf   :  { %2167 = vmatmul.mubr.msk.bf16.gmra.mxu1 %vm1557_vm6, %v1701_v51  ;;  %v3341_v51 = vpop.permute.xlu1 %1418 }
 0x4c0   :  { %1841 = vmatprep.mubr.bf16.mxu1 %v2602_v7  ;;  %v1209_v7 = vlaneseq }
 0x4c2   :  { %v3250_v42 = vshrl.u32 %v1209_v7, 7  ;;  %v3256_v8 = vand.u32 127, %v1209_v7 }
 0x4c4   :  { %v3264_v3 = vsub.s32 0, %v3250_v42  ;;  %v3267_v30 = vsub.s32 1, %v3250_v42  ;;  %v3285_v53 = vsub.s32 4, %v3250_v42  ;;  %vm1211_vm7 = vcmp.lt.s32.totalorder %v3256_v8, 17 }
 0x4c5   :  { %vm1248_vm8 = vcmp.lt.s32.totalorder %v3256_v8, 16  ;;  %v1292_v16 = vsub.s32 2, %v3250_v42  ;;  %v3291_v2 = vsub.s32 3, %v3250_v42  ;;  %v1213_v9 = vsel %vm1211_vm7, %v1204_v45, %v3221_v48 }
 0x4c6   :  { %v1219_v60 = vrot.slane %v3277_v36, %v3264_v3  ;;  %v1231_v10 = vrot.slane %v3272_v59, %v3264_v3  ;;  %v1260_v58 = vrot.slane %v3261_v50, %v3267_v30  ;;  %v1264_v4 = vrot.slane %v3282_v41, %v3267_v30 }
 0x4c7   :  { %2168 = vmatmul.mubr.msk.bf16.gmra.mxu1 %vm1557_vm6, %v1702_v49  ;;  %v1256_v54 = vrot.slane %v3277_v36, %v3267_v30  ;;  %v1268_v17 = vrot.slane %v3272_v59, %v3267_v30  ;;  %v1223_v18 = vrot.slane %v3261_v50, %v3264_v3  ;;  %v1227_v14 = vrot.slane %v3282_v41, %v3264_v3 }
 0x4c8   :  { %v1251_v23 = vsel %vm1248_vm8, %v3228_v22, %v1243_v33  ;;  %v1250_v24 = vsel %vm1248_vm8, %v1243_v33, %v1245_v44  ;;  %v1214_v11 = vsel %vm1211_vm7, %v3217_v15, %v1204_v45  ;;  %v1212_v12 = vsel %vm1211_vm7, %v3221_v48, %v3225_v0 }
 0x4c9   :  { %v1215_v27 = vsel %vm1211_vm7, %v3225_v0, %v3217_v15  ;;  %v1249_v21 = vsel %vm1248_vm8, %v1245_v44, %v1247_v52  ;;  %v1252_v28 = vsel %vm1248_vm8, %v1247_v52, %v3228_v22  ;;  %vm1285_vm9 = vcmp.lt.s32.totalorder %v3256_v8, 15 }
 0x4ca   :  { %v1297_v19 = vrot.slane %v3261_v50, %v1292_v16  ;;  %v1293_v31 = vrot.slane %v3277_v36, %v1292_v16  ;;  %v1301_v48 = vrot.slane %v3282_v41, %v1292_v16  ;;  %v1270_v32 = vmul.f32 %v1260_v58, %v1251_v23 }
 0x4cb   :  { %v1271_v39 = vmul.f32 %v1264_v4, %v1250_v24  ;;  %v1233_v33 = vmul.f32 %v1223_v18, %v1214_v11  ;;  %v1234_v40 = vmul.f32 %v1227_v14, %v1213_v9  ;;  %v1232_v15 = vmul.f32 %v1219_v60, %v1215_v27  ;;  %v3385_v11 = vpop.permute.xlu1 %1451 }
 0x4cc   :  { %v1235_v0 = vmul.f32 %v1231_v10, %v1212_v12  ;;  %v1269_v43 = vmul.f32 %v1256_v54, %v1252_v28  ;;  %v1272_v44 = vmul.f32 %v1268_v17, %v1249_v21  ;;  %v1288_v22 = vsel %vm1285_vm9, %v1278_v34, %v3236_v56  ;;  %v3387_v12 = vpop.permute.xlu0 %1449 }
 0x4cd   :  { %v1289_v52 = vsel %vm1285_vm9, %v1284_v29, %v1278_v34  ;;  %v1305_v45 = vrot.slane %v3272_v59, %v1292_v16  ;;  %vm1322_vm10 = vcmp.lt.s32.totalorder %v3256_v8, 1  ;;  %v1286_v55 = vsel %vm1285_vm9, %v1282_v26, %v1284_v29 }
 0x4ce   :  { %v1287_v49 = vsel %vm1285_vm9, %v3236_v56, %v1282_v26  ;;  %v1334_v7 = vrot.slane %v3261_v50, %v3291_v2  ;;  %v1330_v60 = vrot.slane %v3277_v36, %v3291_v2  ;;  %v1274_v10 = vadd.f32 %v1270_v32, %v1233_v33 }
 0x4cf   :  { %v1275_v58 = vadd.f32 %v1271_v39, %v1234_v40  ;;  %v1338_v34 = vrot.slane %v3282_v41, %v3291_v2  ;;  %v1342_v16 = vrot.slane %v3272_v59, %v3291_v2  ;;  %v1273_v4 = vadd.f32 %v1269_v43, %v1232_v15 }
 0x4d0   :  { %v1276_v29 = vadd.f32 %v1272_v44, %v1235_v0  ;;  %v1307_v54 = vmul.f32 %v1297_v19, %v1288_v22  ;;  %v1306_v17 = vmul.f32 %v1293_v31, %v1289_v52  ;;  %v1308_v18 = vmul.f32 %v1301_v48, %v1287_v49  ;;  %v1456_v52 = vpop.permute.xlu1 %1455 }
 0x4d1   :  { %v1309_v56 = vmul.f32 %v1305_v45, %v1286_v55  ;;  %v1325_v26 = vsel %vm1322_vm10, %v3240_v38, %v3238_v6  ;;  %v1326_v14 = vsel %vm1322_vm10, %v3242_v13, %v3240_v38  ;;  %v1358_v23 = vrot.slane %v3261_v50, %v3285_v53  ;;  %v1454_v45 = vpop.permute.xlu0 %1453 }
 0x4d2   :  { %v1366_v2 = vrot.slane %v3272_v59, %v3285_v53  ;;  %v1323_v24 = vsel %vm1322_vm10, %v3244_v61, %v3242_v13  ;;  %v1324_v9 = vsel %vm1322_vm10, %v3238_v6, %v3244_v61  ;;  %v1354_v38 = vrot.slane %v3277_v36, %v3285_v53 }
 0x4d3   :  { %v1362_v27 = vrot.slane %v3282_v41, %v3285_v53  ;;  %v1390_v21 = vsub.s32 5, %v3250_v42  ;;  %v1311_v28 = vadd.f32 %v1307_v54, %v1274_v10  ;;  %v1310_v19 = vadd.f32 %v1306_v17, %v1273_v4 }
 0x4d4   :  { %v1344_v13 = vmul.f32 %v1334_v7, %v1325_v26  ;;  %v1343_v31 = vmul.f32 %v1330_v60, %v1326_v14  ;;  %v1312_v48 = vadd.f32 %v1308_v18, %v1275_v58  ;;  %v1313_v32 = vadd.f32 %v1309_v56, %v1276_v29  ;;  %v1489_v14 = vpop.permute.xlu1 %1488 }
 0x4d5   :  { %v1345_v39 = vmul.f32 %v1338_v34, %v1324_v9  ;;  %v1346_v6 = vmul.f32 %v1342_v16, %v1323_v24  ;;  %v1368_v61 = vmul.f32 %v1358_v23, %v3049_v5  ;;  %v1370_v33 = vmul.f32 %v1366_v2, %v3152_v37  ;;  %v1487_v23 = vpop.permute.xlu0 %1486 }
 0x4d6   :  { %v1367_v40 = vmul.f32 %v1354_v38, %v3046_v63  ;;  %v1369_v15 = vmul.f32 %v1362_v27, %v3147_v25  ;;  %vm1383_vm11 = vcmp.lt.s32.totalorder %v3256_v8, 127  ;;  %v1427_v53 = vsub.s32 6, %v3250_v42 }
 0x4d7   :  { %v1348_v0 = vadd.f32 %v1344_v13, %v1311_v28  ;;  %v1347_v43 = vadd.f32 %v1343_v31, %v1310_v19  ;;  %v1391_v44 = vrot.slane %v3277_v36, %v1390_v21  ;;  %v1403_v22 = vrot.slane %v3272_v59, %v1390_v21 }
 0x4d8   :  { %v1349_v55 = vadd.f32 %v1345_v39, %v1312_v48  ;;  %v1350_v5 = vadd.f32 %v1346_v6, %v1313_v32  ;;  %v1395_v37 = vrot.slane %v3261_v50, %v1390_v21  ;;  %v1399_v63 = vrot.slane %v3282_v41, %v1390_v21  ;;  %v1493_v39 = vpop.permute.xlu1 %1492 }
 0x4d9   :  { %v1386_v25 = vsel %vm1383_vm11, %v3248_v57, %v3246_v35  ;;  %v1387_v49 = vsel %vm1383_vm11, %v3252_v47, %v3248_v57  ;;  %vm1420_vm12 = vcmp.lt.s32.totalorder %v3256_v8, 113  ;;  %v1464_v7 = vsub.s32 7, %v3250_v42  ;;  %v1491_v6 = vpop.permute.xlu0 %1490 }
 0x4da   :  { %v1384_v60 = vsel %vm1383_vm11, %v3254_v46, %v3252_v47  ;;  %v1385_v10 = vsel %vm1383_vm11, %v3246_v35, %v3254_v46  ;;  %v1428_v58 = vrot.slane %v3277_v36, %v1427_v53  ;;  %v1440_v34 = vrot.slane %v3272_v59, %v1427_v53 }
 0x4db   :  { %v1372_v16 = vadd.f32 %v1368_v61, %v1348_v0  ;;  %v1371_v57 = vadd.f32 %v1367_v40, %v1347_v43  ;;  %v1432_v4 = vrot.slane %v3261_v50, %v1427_v53  ;;  %v1436_v29 = vrot.slane %v3282_v41, %v1427_v53 }
 0x4dc   :  { %v1373_v54 = vadd.f32 %v1369_v15, %v1349_v55  ;;  %v1374_v17 = vadd.f32 %v1370_v33, %v1350_v5  ;;  %v1404_v18 = vmul.f32 %v1391_v44, %v1386_v25  ;;  %v1407_v56 = vmul.f32 %v1403_v22, %v1387_v49  ;;  %v2146_v22 = vld [vmem:[%s3659_s7 + $0x38] ss:$0 sm:$0xff] }
 0x4dd   :  { %v1405_v47 = vmul.f32 %v1395_v37, %v1385_v10  ;;  %v1406_v26 = vmul.f32 %v1399_v63, %v1384_v60  ;;  %v1423_v35 = vsel %vm1420_vm12, %v3303_v62, %v3301_v1  ;;  %v1424_v46 = vsel %vm1420_vm12, %v3341_v51, %v3303_v62 }
 0x4de   :  { %v1421_v2 = vsel %vm1420_vm12, %v3343_v20, %v3341_v51  ;;  %v1422_v24 = vsel %vm1420_vm12, %v3301_v1, %v3343_v20  ;;  %vm1457_vm13 = vcmp.lt.s32.totalorder %v3256_v8, 112  ;;  %v1465_v9 = vrot.slane %v3277_v36, %v1464_v7 }
 0x4df   :  { %v1473_v38 = vrot.slane %v3282_v41, %v1464_v7  ;;  %v1408_v27 = vadd.f32 %v1404_v18, %v1371_v57  ;;  %v1411_v62 = vadd.f32 %v1407_v56, %v1374_v17  ;;  %v1441_v21 = vmul.f32 %v1428_v58, %v1423_v35  ;;  %v1616_v58 = vpop.f32.mrf.mxu0 }
 0x4e0   :  { %v1444_v28 = vmul.f32 %v1440_v34, %v1424_v46  ;;  %v1409_v19 = vadd.f32 %v1405_v47, %v1372_v16  ;;  %v1410_v13 = vadd.f32 %v1406_v26, %v1373_v54  ;;  %v1442_v31 = vmul.f32 %v1432_v4, %v1422_v24 }
 0x4e1   :  { %v1443_v48 = vmul.f32 %v1436_v29, %v1421_v2  ;;  %v1460_v51 = vsel %vm1457_vm13, %v3387_v12, %v3385_v11  ;;  %v1477_v1 = vrot.slane %v3272_v59, %v1464_v7  ;;  %v1469_v20 = vrot.slane %v3261_v50, %v1464_v7  ;;  %v1618_v29 = vpop.f32.mrf.mxu0 }
 0x4e2   :  { %v1458_v36 = vsel %vm1457_vm13, %v1454_v45, %v1456_v52  ;;  %v1461_v41 = vsel %vm1457_vm13, %v1456_v52, %v3387_v12  ;;  %v1459_v32 = vsel %vm1457_vm13, %v3385_v11, %v1454_v45  ;;  %vm1494_vm14 = vcmp.lt.s32.totalorder %v3256_v8, 111  ;;  %v2143_v12 = vld [vmem:[%s3659_s7 + $0x20] ss:$0 sm:$0xff]  ;;  %v2145_v11 = vld [vmem:[%s3659_s7 + $0x30] ss:$0 sm:$0xff] }
 0x4e3   :  { %v1445_v61 = vadd.f32 %v1441_v21, %v1408_v27  ;;  %v1448_v33 = vadd.f32 %v1444_v28, %v1411_v62  ;;  %v1446_v59 = vadd.f32 %v1442_v31, %v1409_v19  ;;  %v1447_v40 = vadd.f32 %v1443_v48, %v1410_v13  ;;  %v2144_v45 = vld [vmem:[%s3659_s7 + $0x28] ss:$0 sm:$0xff]  ;;  %v1620_v18 = vpop.f32.mrf.mxu0 }
 0x4e4   :  { %v1478_v50 = vmul.f32 %v1465_v9, %v1460_v51  ;;  %v1480_v15 = vmul.f32 %v1473_v38, %v1458_v36  ;;  %v1481_v53 = vmul.f32 %v1477_v1, %v1461_v41  ;;  %v1479_v0 = vmul.f32 %v1469_v20, %v1459_v32 }
 0x4e5   :  { %v1497_v43 = vsel %vm1494_vm14, %v1487_v23, %v1489_v14  ;;  %v1495_v44 = vsel %vm1494_vm14, %v1491_v6, %v1493_v39  ;;  %v1498_v52 = vsel %vm1494_vm14, %v1493_v39, %v1487_v23  ;;  %v1496_v55 = vsel %vm1494_vm14, %v1489_v14, %v1491_v6  ;;  %v1622_v47 = vpop.f32.mrf.mxu0 }
 0x4e6   :  { %v1482_v5 = vadd.f32 %v1478_v50, %v1445_v61  ;;  %v1484_v37 = vadd.f32 %v1480_v15, %v1447_v40  ;;  %v1515_v63 = vmul.f32 %v2143_v12, %v1497_v43  ;;  %v1517_v25 = vmul.f32 %v2145_v11, %v1495_v44  ;;  %v2546_v43 = vld [vmem:[%s3652_s0 + $0x8] sm:$0xff] }
 0x4e7   :  { %v1485_v49 = vadd.f32 %v1481_v53, %v1448_v33  ;;  %v1483_v7 = vadd.f32 %v1479_v0, %v1446_v59  ;;  %v1518_v60 = vmul.f32 %v2146_v22, %v1498_v52  ;;  %v1516_v10 = vmul.f32 %v2144_v45, %v1496_v55  ;;  %v1626_v26 = vpop.f32.mrf.mxu0 }
 0x4e8   :  { %v1519_v34 = vadd.f32 %v1515_v63, %v1482_v5  ;;  %v1521_v16 = vadd.f32 %v1517_v25, %v1484_v37  ;;  %v2610_v21 = vmov 1966171168   ;;  %v2547_v5 = vld [vmem:[%s3652_s0 + $0x10] sm:$0xff] }
 0x4e9   :  { %v1522_v57 = vadd.f32 %v1518_v60, %v1485_v49  ;;  %v1520_v4 = vadd.f32 %v1516_v10, %v1483_v7  ;;  %v1628_v35 = vpop.f32.mrf.mxu0  ;;  %v1920_v28 = vunpack.c.l.s4 %v2610_v21  ;;  %v2548_v7 = vld [vmem:[%s3652_s0 + $0x18] sm:$0xff] }
 0x4ea   :  { %v1523_v54 = vadd.f32 %v1521_v16, %v1519_v34 }
 0x4eb   :  { %v1524_v17 = vadd.f32 %v1522_v57, %v1520_v4  ;;  %v3480_v46 = vpop.f32.mrf.mxu0  ;;  %v1921_v31 = vunpack.c.0.s8 %v1920_v28  ;;  %v2549_v57 = vld [vmem:[%s3652_s0 + $0x20] sm:$0xff] }
 0x4ec   :  { %v2147_v56 = vmul.f32 -1.442695, %v1523_v54 }
 0x4ed   :  { %v2148_v8 = vmul.f32 -1.442695, %v1524_v17  ;;  %v3482_v2 = vpop.f32.mrf.mxu0  ;;  %v1924_v20 = vsub.s32 %v1921_v31, %v3250_v42  ;;  %v2545_v42 = vld [vmem:[%s3652_s0] sm:$0xff] }
 0x4ee   :  { %2537 = vpow2.f32 %v2147_v56  ;;  %v2550_v56 = vld [vmem:[%s3652_s0 + $0x28] sm:$0xff] }
 0x4ef   :  { %2539 = vpow2.f32 %v2148_v8  ;;  %v3484_v38 = vpop.f32.mrf.mxu0 }
 0x4f1   :  { %v3486_v27 = vpop.f32.mrf.mxu0 }
 0x4f3   :  { %v3488_v62 = vpop.f32.mrf.mxu0 }
 0x4f5   :  { %v3490_v19 = vpop.f32.mrf.mxu0 }
 0x4f7   :  { %v3492_v51 = vpop.f32.mrf.mxu0 }
 0x4f9   :  { %v3495_v36 = vpop.f32.mrf.mxu0 }
 0x4fb   :  { %v2538_v14 = vpop.eup %2537  ;;  %v3497_v32 = vpop.f32.mrf.mxu0 }
 0x4fc   :  { %v2540_v23 = vpop.eup %2539  ;;  %v1531_v24 = vadd.f32 1.0, %v2538_v14 }
 0x4fd   :  { %v1532_v9 = vadd.f32 1.0, %v2540_v23  ;;  %v3501_v6 = vpop.f32.mrf.mxu0 }
 0x4fe   :  { %2541 = vrcp.f32 %v1531_v24 }
 0x4ff   :  { %2543 = vrcp.f32 %v1532_v9  ;;  %v3505_v40 = vpop.f32.mrf.mxu0 }
 0x501   :  { %v3515_v52 = vpop.f32.mrf.mxu0 }
 0x50b   :  { %v2542_v13 = vpop.eup %2541 }
 0x50c   :  { %v2544_v48 = vpop.eup %2543 }
 0x50d   :  { %v1918_v1 = vcombine.low %v2542_v13, %v2544_v48 }
 0x50f   :  { %v1925_v41 = vrot.slane %v1918_v1, %v1924_v20 }
 0x511   :  { %v3499_v39 = vrot.slane %v1925_v41, %v1924_v20  ;;  %v1926_v54 = vcombine.high %v1925_v41, %v1925_v41 }
 0x513   :  { %v1946_v59 = vrot.slane %v3499_v39, %v3264_v3  ;;  %v1950_v44 = vrot.slane %v3499_v39, %v3267_v30  ;;  %v3538_v21 = vrot.slane %v1926_v54, %v1924_v20 }
 0x54f   :  { %v1773_v61 = vpop.f32.mrf.mxu1 }
 0x550   :  { %v1852_v33 = vmul.f32 %v1773_v61, %v1616_v58  ;;  %v3523_v58 = vpop.f32.mrf.mxu0 }
 0x551   :  { %v1775_v50 = vpop.f32.mrf.mxu1 }
 0x552   :  { %v1884_v15 = vmul.f32 %v2545_v42, %v1852_v33  ;;  %v1853_v53 = vmul.f32 %v1775_v50, %v1618_v29  ;;  %v1954_v33 = vrot.slane %v3538_v21, %v3264_v3 }
 0x553   :  { %v1777_v0 = vpop.f32.mrf.mxu1 }
 0x554   :  { %v1983_v12 = vmul.f32 %v1946_v59, %v1884_v15  ;;  %v1885_v11 = vmul.f32 %v2546_v43, %v1853_v53  ;;  %v1854_v22 = vmul.f32 %v1777_v0, %v1620_v18  ;;  %v1958_v53 = vrot.slane %v3538_v21, %v3267_v30 }
 0x555   :  { %v1779_v45 = vpop.f32.mrf.mxu1 }
 0x556   :  { %2015 = vst [vmem:[#allocation2] sm:$0xff] %v1983_v12  ;;  %v1984_v55 = vmul.f32 %v1950_v44, %v1885_v11  ;;  %v1886_v37 = vmul.f32 %v2547_v5, %v1854_v22  ;;  %v1855_v63 = vmul.f32 %v1779_v45, %v1622_v47  ;;  %v2556_v5 = vld [vmem:[%s3652_s0 + $0x58] sm:$0xff] }
 0x557   :  { %v1783_v25 = vpop.f32.mrf.mxu1 }
 0x558   :  { %2016 = vst [vmem:[#allocation2 + $0x8] sm:$0xff] %v1984_v55  ;;  %v1985_v49 = vmul.f32 %v1946_v59, %v1886_v37  ;;  %v1887_v60 = vmul.f32 %v2548_v7, %v1855_v63  ;;  %v1856_v10 = vmul.f32 %v1783_v25, %v1626_v26  ;;  %v3532_v26 = vpop.f32.mrf.mxu0  ;;  %v2557_v7 = vld [vmem:[%s3652_s0 + $0x60] sm:$0xff] }
 0x559   :  { %v1785_v34 = vpop.f32.mrf.mxu1 }
 0x55a   :  { %2017 = vst [vmem:[#allocation2 + $0x10] sm:$0xff] %v1985_v49  ;;  %v1986_v16 = vmul.f32 %v1950_v44, %v1887_v60  ;;  %v1888_v4 = vmul.f32 %v2549_v57, %v1856_v10  ;;  %v1857_v29 = vmul.f32 %v1785_v34, %v1628_v35  ;;  %v2551_v35 = vld [vmem:[%s3652_s0 + $0x30] sm:$0xff]  ;;  %v3544_v1 = vpop.f32.mrf.mxu0 }
 0x55b   :  { %v1787_v17 = vpop.f32.mrf.mxu1 }
 0x55c   :  { %2018 = vst [vmem:[#allocation2 + $0x18] sm:$0xff] %v1986_v16  ;;  %v1987_v18 = vmul.f32 %v1946_v59, %v1888_v4  ;;  %v1889_v8 = vmul.f32 %v2550_v56, %v1857_v29  ;;  %v1858_v47 = vmul.f32 %v1787_v17, %v3480_v46  ;;  %v2552_v46 = vld [vmem:[%s3652_s0 + $0x38] sm:$0xff]  ;;  %v3558_v12 = vpop.f32.mrf.mxu0  ;;  %v2558_v16 = vld [vmem:[%s3652_s0 + $0x68] sm:$0xff]  ;;  %v2559_v17 = vld [vmem:[%s3652_s0 + $0x70] sm:$0xff]  ;;  %v1941_v56 = vcombine.high %v3499_v39, %v3499_v39 }
 0x55d   :  { %v1789_v14 = vpop.f32.mrf.mxu1 }
 0x55e   :  { %2019 = vst [vmem:[#allocation2 + $0x20] sm:$0xff] %v1987_v18  ;;  %v1988_v23 = vmul.f32 %v1950_v44, %v1889_v8  ;;  %v1890_v24 = vmul.f32 %v2551_v35, %v1858_v47  ;;  %v1859_v9 = vmul.f32 %v1789_v14, %v3482_v2  ;;  %v2553_v2 = vld [vmem:[%s3652_s0 + $0x40] sm:$0xff]  ;;  %v3568_v63 = vpop.f32.mrf.mxu0  ;;  %v1962_v39 = vrot.slane %v1941_v56, %v3264_v3 }
 0x55f   :  { %v1793_v28 = vpop.f32.mrf.mxu1 }
 0x560   :  { %2020 = vst [vmem:[#allocation2 + $0x28] sm:$0xff] %v1988_v23  ;;  %v1989_v13 = vmul.f32 %v1946_v59, %v1890_v24  ;;  %v1891_v31 = vmul.f32 %v2552_v46, %v1859_v9  ;;  %v1860_v48 = vmul.f32 %v1793_v28, %v3484_v38  ;;  %v2554_v38 = vld [vmem:[%s3652_s0 + $0x48] sm:$0xff]  ;;  %v1672_v4 = vpop.f32.mrf.mxu0 }
 0x561   :  { %v1795_v41 = vpop.f32.mrf.mxu1 }
 0x562   :  { %2021 = vst [vmem:[#allocation2 + $0x30] sm:$0xff] %v1989_v13  ;;  %v1990_v61 = vmul.f32 %v1950_v44, %v1891_v31  ;;  %v1892_v20 = vmul.f32 %v2553_v2, %v1860_v48  ;;  %v1861_v59 = vmul.f32 %v1795_v41, %v3486_v27  ;;  %v2555_v27 = vld [vmem:[%s3652_s0 + $0x50] sm:$0xff]  ;;  %v1676_v35 = vpop.f32.mrf.mxu0  ;;  %v1966_v41 = vrot.slane %v1941_v56, %v3267_v30  ;;  %v2570_v56 = vld [vmem:[%s3652_s0 + $0xc8] sm:$0xff] }
 0x563   :  { %v1797_v50 = vpop.f32.mrf.mxu1 }
 0x564   :  { %2022 = vst [vmem:[#allocation2 + $0x38] sm:$0xff] %v1990_v61  ;;  %v1991_v42 = vmul.f32 %v1954_v33, %v1892_v20  ;;  %v1893_v15 = vmul.f32 %v2554_v38, %v1861_v59  ;;  %v1862_v0 = vmul.f32 %v1797_v50, %v3488_v62  ;;  %v1678_v2 = vpop.f32.mrf.mxu0 }
 0x565   :  { %v1799_v43 = vpop.f32.mrf.mxu1 }
 0x566   :  { %2023 = vst [vmem:[#allocation2 + $0x40] sm:$0xff] %v1991_v42  ;;  %v1992_v11 = vmul.f32 %v1958_v53, %v1893_v15  ;;  %v1894_v44 = vmul.f32 %v2555_v27, %v1862_v0  ;;  %v1863_v22 = vmul.f32 %v1799_v43, %v3490_v19  ;;  %v2564_v15 = vld [vmem:[%s3652_s0 + $0x98] sm:$0xff]  ;;  %v1680_v0 = vpop.f32.mrf.mxu0  ;;  %v2565_v27 = vld [vmem:[%s3652_s0 + $0xa0] sm:$0xff] }
 0x567   :  { %v1803_v45 = vpop.f32.mrf.mxu1 }
 0x568   :  { %2024 = vst [vmem:[#allocation2 + $0x48] sm:$0xff] %v1992_v11  ;;  %v1993_v55 = vmul.f32 %v1954_v33, %v1894_v44  ;;  %v1895_v62 = vmul.f32 %v2556_v5, %v1863_v22  ;;  %v1864_v37 = vmul.f32 %v1803_v45, %v3492_v51 }
 0x569   :  { %v1805_v25 = vpop.f32.mrf.mxu1 }
 0x56a   :  { %2025 = vst [vmem:[#allocation2 + $0x50] sm:$0xff] %v1993_v55  ;;  %v1994_v49 = vmul.f32 %v1958_v53, %v1895_v62  ;;  %v1896_v19 = vmul.f32 %v2557_v7, %v1864_v37  ;;  %v1865_v60 = vmul.f32 %v1805_v25, %v3495_v36  ;;  %v2566_v55 = vld [vmem:[%s3652_s0 + $0xa8] sm:$0xff]  ;;  %v1682_v62 = vpop.f32.mrf.mxu0 }
 0x56b   :  { %v1807_v10 = vpop.f32.mrf.mxu1 }
 0x56c   :  { %2026 = vst [vmem:[#allocation2 + $0x58] sm:$0xff] %v1994_v49  ;;  %v1995_v34 = vmul.f32 %v1954_v33, %v1896_v19  ;;  %v1897_v51 = vmul.f32 %v2558_v16, %v1865_v60  ;;  %v1866_v57 = vmul.f32 %v1807_v10, %v3497_v32  ;;  %v2560_v32 = vld [vmem:[%s3652_s0 + $0x78] sm:$0xff]  ;;  %v2567_v49 = vld [vmem:[%s3652_s0 + $0xb0] sm:$0xff]  ;;  %v1942_v19 = vcombine.high %v3538_v21, %v3538_v21 }
 0x56d   :  { %v1809_v29 = vpop.f32.mrf.mxu1 }
 0x56e   :  { %2027 = vst [vmem:[#allocation2 + $0x60] sm:$0xff] %v1995_v34  ;;  %v1996_v54 = vmul.f32 %v1958_v53, %v1897_v51  ;;  %v1898_v18 = vmul.f32 %v2559_v17, %v1866_v57  ;;  %v1867_v36 = vmul.f32 %v1809_v29, %v3501_v6  ;;  %v2561_v6 = vld [vmem:[%s3652_s0 + $0x80] sm:$0xff]  ;;  %v1686_v51 = vpop.f32.mrf.mxu0  ;;  %v1970_v21 = vrot.slane %v1942_v19, %v3264_v3  ;;  %v2571_v3 = vld [vmem:[%s3652_s0 + $0xd0] sm:$0xff] }
 0x56f   :  { %v1813_v8 = vpop.f32.mrf.mxu1 }
 0x570   :  { %2028 = vst [vmem:[#allocation2 + $0x68] sm:$0xff] %v1996_v54  ;;  %v1997_v47 = vmul.f32 %v1954_v33, %v1898_v18  ;;  %v1899_v14 = vmul.f32 %v2560_v32, %v1867_v36  ;;  %v1868_v23 = vmul.f32 %v1813_v8, %v3505_v40  ;;  %v2562_v40 = vld [vmem:[%s3652_s0 + $0x88] sm:$0xff] }
 0x571   :  { %v1815_v24 = vpop.f32.mrf.mxu1 }
 0x572   :  { %2029 = vst [vmem:[#allocation2 + $0x70] sm:$0xff] %v1997_v47  ;;  %v1998_v9 = vmul.f32 %v1958_v53, %v1899_v14  ;;  %v1900_v28 = vmul.f32 %v2561_v6, %v1868_v23  ;;  %v1869_v13 = vmul.f32 %v1815_v24, %v3515_v52  ;;  %v2563_v52 = vld [vmem:[%s3652_s0 + $0x90] sm:$0xff]  ;;  %v1974_v47 = vrot.slane %v1942_v19, %v3267_v30  ;;  %v1688_v14 = vpop.f32.mrf.mxu0 }
 0x573   :  { %v1817_v46 = vpop.f32.mrf.mxu1 }
 0x574   :  { %2030 = vst [vmem:[#allocation2 + $0x78] sm:$0xff] %v1998_v9  ;;  %v1999_v31 = vmul.f32 %v1962_v39, %v1900_v28  ;;  %v1901_v48 = vmul.f32 %v2562_v40, %v1869_v13  ;;  %v1870_v61 = vmul.f32 %v1817_v46, %v3523_v58  ;;  %v1690_v46 = vpop.f32.mrf.mxu0 }
 0x575   :  { %v1819_v20 = vpop.f32.mrf.mxu1 }
 0x576   :  { %2031 = vst [vmem:[#allocation2 + $0x80] sm:$0xff] %v1999_v31  ;;  %v2000_v33 = vmul.f32 %v1966_v41, %v1901_v48  ;;  %v1902_v59 = vmul.f32 %v2563_v52, %v1870_v61  ;;  %v1871_v50 = vmul.f32 %v1819_v20, %v3532_v26  ;;  %v2573_v48 = vld [vmem:[%s3652_s0 + $0xe0] sm:$0xff] }
 0x577   :  { %v1823_v42 = vpop.f32.mrf.mxu1 }
 0x578   :  { %2032 = vst [vmem:[#allocation2 + $0x88] sm:$0xff] %v2000_v33  ;;  %v2001_v38 = vmul.f32 %v1962_v39, %v1902_v59  ;;  %v1903_v53 = vmul.f32 %v2564_v15, %v1871_v50  ;;  %v1872_v58 = vmul.f32 %v1823_v42, %v3544_v1  ;;  %v2574_v33 = vld [vmem:[%s3652_s0 + $0xe8] sm:$0xff]  ;;  %v1692_v50 = vpop.f32.mrf.mxu0  ;;  %v2575_v15 = vld [vmem:[%s3652_s0 + $0xf0] sm:$0xff] }
 0x579   :  { %v1825_v43 = vpop.f32.mrf.mxu1 }
 0x57a   :  { %2033 = vst [vmem:[#allocation2 + $0x90] sm:$0xff] %v2001_v38  ;;  %v2002_v11 = vmul.f32 %v1966_v41, %v1903_v53  ;;  %v1904_v44 = vmul.f32 %v2565_v27, %v1872_v58  ;;  %v1873_v26 = vmul.f32 %v1825_v43, %v3558_v12  ;;  %v2576_v43 = vld [vmem:[%s3652_s0 + $0xf8] sm:$0xff] }
 0x57b   :  { %v1827_v22 = vpop.f32.mrf.mxu1 }
 0x57c   :  { %2034 = vst [vmem:[#allocation2 + $0x98] sm:$0xff] %v2002_v11  ;;  %v2003_v45 = vmul.f32 %v1962_v39, %v1904_v44  ;;  %v1905_v5 = vmul.f32 %v2566_v55, %v1873_v26  ;;  %v1874_v1 = vmul.f32 %v1827_v22, %v3568_v63  ;;  %v2568_v63 = vld [vmem:[%s3652_s0 + $0xb8] sm:$0xff] }
 0x57d   :  { %v1829_v37 = vpop.f32.mrf.mxu1 }
 0x57e   :  { %2035 = vst [vmem:[#allocation2 + $0xa0] sm:$0xff] %v2003_v45  ;;  %v2004_v25 = vmul.f32 %v1966_v41, %v1905_v5  ;;  %v1906_v7 = vmul.f32 %v2567_v49, %v1874_v1  ;;  %v1875_v12 = vmul.f32 %v1829_v37, %v1672_v4  ;;  %v2569_v4 = vld [vmem:[%s3652_s0 + $0xc0] sm:$0xff] }
 0x57f   :  { %v1833_v60 = vpop.f32.mrf.mxu1 }
 0x580   :  { %2036 = vst [vmem:[#allocation2 + $0xa8] sm:$0xff] %v2004_v25  ;;  %v2005_v10 = vmul.f32 %v1962_v39, %v1906_v7  ;;  %v1907_v34 = vmul.f32 %v2568_v63, %v1875_v12  ;;  %v1876_v16 = vmul.f32 %v1833_v60, %v1676_v35  ;;  %v2572_v39 = vld [vmem:[%s3652_s0 + $0xd8] sm:$0xff] }
 0x581   :  { %v1835_v57 = vpop.f32.mrf.mxu1 }
 0x582   :  { %2037 = vst [vmem:[#allocation2 + $0xb0] sm:$0xff] %v2005_v10  ;;  %v2006_v29 = vmul.f32 %v1966_v41, %v1907_v34  ;;  %v1908_v54 = vmul.f32 %v2569_v4, %v1876_v16  ;;  %v1877_v17 = vmul.f32 %v1835_v57, %v1678_v2 }
 0x583   :  { %v1837_v18 = vpop.f32.mrf.mxu1 }
 0x584   :  { %2038 = vst [vmem:[#allocation2 + $0xb8] sm:$0xff] %v2006_v29  ;;  %v2007_v36 = vmul.f32 %v1970_v21, %v1908_v54  ;;  %v1909_v8 = vmul.f32 %v2570_v56, %v1877_v17  ;;  %v1878_v32 = vmul.f32 %v1837_v18, %v1680_v0 }
 0x585   :  { %v1839_v23 = vpop.f32.mrf.mxu1 }
 0x586   :  { %2039 = vst [vmem:[#allocation2 + $0xc0] sm:$0xff] %v2007_v36  ;;  %v2008_v35 = vmul.f32 %v1974_v47, %v1909_v8  ;;  %v1910_v24 = vmul.f32 %v2571_v3, %v1878_v32  ;;  %v1879_v9 = vmul.f32 %v1839_v23, %v1682_v62 }
 0x587   :  { %v1843_v6 = vpop.f32.mrf.mxu1 }
 0x588   :  { %2040 = vst [vmem:[#allocation2 + $0xc8] sm:$0xff] %v2008_v35  ;;  %v2009_v28 = vmul.f32 %v1970_v21, %v1910_v24  ;;  %v1911_v13 = vmul.f32 %v2572_v39, %v1879_v9  ;;  %v1880_v30 = vmul.f32 %v1843_v6, %v1686_v51 }
 0x589   :  { %v1845_v31 = vpop.f32.mrf.mxu1 }
 0x58a   :  { %2041 = vst [vmem:[#allocation2 + $0xd0] sm:$0xff] %v2009_v28  ;;  %v2010_v40 = vmul.f32 %v1974_v47, %v1911_v13  ;;  %v1912_v41 = vmul.f32 %v2573_v48, %v1880_v30  ;;  %v1881_v61 = vmul.f32 %v1845_v31, %v1688_v14 }
 0x58b   :  { %v1847_v2 = vpop.f32.mrf.mxu1 }
 0x58c   :  { %2042 = vst [vmem:[#allocation2 + $0xd8] sm:$0xff] %v2010_v40  ;;  %v2011_v20 = vmul.f32 %v1970_v21, %v1912_v41  ;;  %v1913_v52 = vmul.f32 %v2574_v33, %v1881_v61  ;;  %v1882_v59 = vmul.f32 %v1847_v2, %v1690_v46 }
 0x58d   :  { %v1849_v42 = vpop.f32.mrf.mxu1 }
 0x58e   :  { %2043 = vst [vmem:[#allocation2 + $0xe0] sm:$0xff] %v2011_v20  ;;  %v2012_v38 = vmul.f32 %v1974_v47, %v1913_v52  ;;  %v1914_v53 = vmul.f32 %v2575_v15, %v1882_v59  ;;  %v1883_v58 = vmul.f32 %v1849_v42, %v1692_v50 }
 0x590   :  { %2044 = vst [vmem:[#allocation2 + $0xe8] sm:$0xff] %v2012_v38  ;;  %v2013_v0 = vmul.f32 %v1970_v21, %v1914_v53  ;;  %v1915_v11 = vmul.f32 %v2576_v43, %v1883_v58 }
 0x592   :  { %2045 = vst [vmem:[#allocation2 + $0xf0] sm:$0xff] %v2013_v0  ;;  %v2014_v27 = vmul.f32 %v1974_v47, %v1915_v11 }
 0x594   :  { %2046 = vst [vmem:[#allocation2 + $0xf8] sm:$0xff] %v2014_v27 }
 0x595   :  { %2588 = shalt.err (!%p2585_p4)
}
 0x596   :  { %s2612_s14 = smov 256  }
 0x597   :  { %2058 = dma.vmem_to_hbm [thread:$0]  %s2053_s12, 4096, %s3660_s8, [#allocation3], %s2612_s14, %s2612_s14, %s2604_s4  }
 0x598   :  { %2597 = dma.done.wait [#allocation3], 4096  }
 0x599   :  { %2598 = vsyncadd [#allocation3], 4294963200 }
 0x59a   :  { %2062 = vsyncpa [#allocation3], 1 }

</bundles_post_ra>
